<compile_context>
chip_gen: v6e
topology: v6e:2x2x1
jax: 0.10.0
libtpu: 0.0.40
codegen_flags: <defaults>
</compile_context>

<pallas_src>
import functools

import jax
import jax.numpy as jnp
from jax.experimental import pallas as pl
from jax.experimental.pallas import tpu as pltpu

LANE = 128      # lane width: packed 4H gate dim is padded to a multiple of this
SUBLANE = 8     # batch padded to sublane width -> aligned pl.ds row windows
MAX_CHUNK = 256  # timesteps per grid step (bounds VMEM independent of S)


def _round_up(v, m):
    return (v + m - 1) // m * m


def _fused_lstm_kernel(num_layers, chunk, bp, h, xproj0_ref, *refs):
    """One sequence chunk of the whole stacked LSTM (all layers) per grid step.

    Inputs:
      xproj0_ref : (chunk*Bp, Gp) f32   hoisted  x @ W_ih_0^T + b_0  for this chunk
      w_hh[l]    : (H, Gp)        bf16  per layer, l = 0..L-1
      w_ih[l]    : (H, Gp)        bf16  per layer, l = 1..L-1
      b[l]       : (1, Gp)        f32   per layer, l = 1..L-1
    Output:
      out_ref    : (chunk*Bp, H)  f32   last layer's h for this chunk (also used
                                        as the inter-layer sequence buffer)
    Scratch (persist across chunks):
      xproj_scr  : (chunk*Bp, Gp) f32   next layer's input projection
      h_scr,c_scr: (L, Bp, H)     f32   recurrent state carried across chunks
    """
    w_hh_refs = refs[0:num_layers]
    w_ih_refs = refs[num_layers:2 * num_layers - 1]
    b_refs = refs[2 * num_layers - 1:3 * num_layers - 2]
    out_ref, xproj_scr, h_scr, c_scr = refs[3 * num_layers - 2:]

    # Recurrent state is carried across sequence chunks in VMEM scratch.
    @pl.when(pl.program_id(0) == 0)
    def _():
        h_scr[...] = jnp.zeros_like(h_scr)
        c_scr[...] = jnp.zeros_like(c_scr)

    for layer in range(num_layers):                 # static unroll over layers
        # Layer 0 reads its hoisted projection straight from the input block
        # (no full-tensor VMEM copy).
        src = xproj0_ref if layer == 0 else xproj_scr
        # Hoisted out of the timestep loop: W_hh loaded once per layer/chunk.
        w_hh = w_hh_refs[layer][...]

        def step(t, carry, _layer=layer, _src=src, _w=w_hh):
            row = pl.multiple_of(t * bp, bp)
            xp = _src[pl.ds(row, bp), :]            # (Bp, Gp) f32, aligned read
            h_prev = h_scr[_layer]                  # (Bp, H)  f32
            c_prev = c_scr[_layer]
            # Only the small recurrent matmul stays inside the serial loop.
            gates = xp + jnp.dot(h_prev.astype(jnp.bfloat16), _w,
                                 preferred_element_type=jnp.float32)
            # One sigmoid + one tanh pass over the packed (i|f|g|o) gates vreg.
            sig = jax.nn.sigmoid(gates)
            tnh = jnp.tanh(gates)
            i_g = sig[:, 0 * h:1 * h]
            f_g = sig[:, 1 * h:2 * h]
            g_g = tnh[:, 2 * h:3 * h]
            o_g = sig[:, 3 * h:4 * h]
            c_new = f_g * c_prev + i_g * g_g
            h_new = o_g * jnp.tanh(c_new)
            c_scr[_layer] = c_new
            h_scr[_layer] = h_new
            # out_ref doubles as the inter-layer sequence buffer; the last
            # layer's store here IS the final output (no extra copy pass).
            out_ref[pl.ds(row, bp), :] = h_new
            return carry

        jax.lax.fori_loop(0, chunk, step, 0, unroll=min(chunk, 8))

        if layer + 1 < num_layers:
            # Next layer's non-recurrent projection: one chunk-sized GEMM.
            xproj_scr[...] = (
                jnp.dot(out_ref[...].astype(jnp.bfloat16),
                        w_ih_refs[layer][...],
                        preferred_element_type=jnp.float32)
                + b_refs[layer][...])


def _pack_weight(w, gp):
    """PyTorch (4H, Din) -> (Din, Gp): transposed, gates contiguous, zero-pad to Gp."""
    din = w.shape[1]
    four_h = w.shape[0]
    out = jnp.zeros((din, gp), jnp.float32)
    return out.at[:, :four_h].set(w.astype(jnp.float32).T)


def _pack_bias(b_ih, b_hh, gp):
    b = (b_ih + b_hh).astype(jnp.float32)
    out = jnp.zeros((1, gp), jnp.float32)
    return out.at[0, :b.shape[0]].set(b)


@jax.jit
def lstm_forward(x, params):
    """Stacked LSTM forward (eval mode: dropout == identity).

    x      : (S, B, I) float32
    params : list of (w_ih (4H,Din), w_hh (4H,H), b_ih (4H,), b_hh (4H,)) per layer
    returns (S, B, H)
    """
    S, B, I = x.shape
    num_layers = len(params)
    H = params[0][1].shape[1]
    Gp = _round_up(4 * H, LANE)                    # packed 4H gate width
    Bp = _round_up(max(B, SUBLANE), SUBLANE)

    chunk = min(S, MAX_CHUNK)                      # timesteps per grid step
    Sp = _round_up(S, chunk)
    num_chunks = Sp // chunk

    # ---- glue: pack weights (gates contiguous, single lane pad at the end) --
    w_ih0_p = _pack_weight(params[0][0], Gp)                       # (I, Gp)
    b0_p = _pack_bias(params[0][2], params[0][3], Gp)              # (1, Gp)
    w_hh_p = [_pack_weight(p[1], Gp).astype(jnp.bfloat16) for p in params]
    w_ih_p = [_pack_weight(p[0], Gp).astype(jnp.bfloat16) for p in params[1:]]
    b_p = [_pack_bias(p[2], p[3], Gp) for p in params[1:]]

    # ---- hoist layer-0's non-recurrent x-projection: one big XLA GEMM -------
    x_pad = jnp.zeros((Sp, Bp, I), jnp.float32).at[:S, :B, :].set(
        x.astype(jnp.float32))
    x2d = x_pad.reshape(Sp * Bp, I)
    xproj0 = (jnp.dot(x2d.astype(jnp.bfloat16), w_ih0_p.astype(jnp.bfloat16),
                      preferred_element_type=jnp.float32) + b0_p)   # (Sp*Bp, Gp)

    kernel = functools.partial(_fused_lstm_kernel, num_layers, chunk, Bp, H)

    def const2d(shape):
        return pl.BlockSpec(shape, lambda c: (0, 0))

    in_specs = ([pl.BlockSpec((chunk * Bp, Gp), lambda c: (c, 0))]   # xproj0 chunk
                + [const2d((H, Gp))] * num_layers                    # w_hh, all layers
                + [const2d((H, Gp))] * (num_layers - 1)              # w_ih, layers 1..
                + [const2d((1, Gp))] * (num_layers - 1))             # bias, layers 1..

    xproj_scr_shape = (chunk * Bp, Gp) if num_layers > 1 else (SUBLANE, LANE)

    y_pad = pl.pallas_call(
        kernel,
        out_shape=jax.ShapeDtypeStruct((Sp * Bp, H), jnp.float32),
        grid_spec=pltpu.PrefetchScalarGridSpec(
            num_scalar_prefetch=0,
            grid=(num_chunks,),                    # sequence chunks, state carried
            in_specs=in_specs,
            out_specs=pl.BlockSpec((chunk * Bp, H), lambda c: (c, 0)),
            scratch_shapes=[
                pltpu.VMEM(xproj_scr_shape, jnp.float32),        # next-layer xproj
                pltpu.VMEM((num_layers, Bp, H), jnp.float32),    # h state (carried)
                pltpu.VMEM((num_layers, Bp, H), jnp.float32),    # c state (carried)
            ]),
        compiler_params=pltpu.CompilerParams(
            dimension_semantics=("arbitrary",),    # recurrence over chunks
            vmem_limit_bytes=32 * 1024 * 1024),
    )(xproj0, *w_hh_p, *w_ih_p, *b_p)

    return y_pad.reshape(Sp, Bp, H)[:S, :B, :]


def init_lstm_params(key, input_size, hidden_size, num_layers):
    """Deterministic synthetic params, shaped like torch.nn.LSTM parameters."""
    params = []
    bound = 1.0 / jnp.sqrt(jnp.float32(hidden_size))
    for layer in range(num_layers):
        in_dim = input_size if layer == 0 else hidden_size
        key, k1, k2, k3, k4 = jax.random.split(key, 5)
        w_ih = jax.random.uniform(k1, (4 * hidden_size, in_dim),
                                  jnp.float32, -bound, bound)
        w_hh = jax.random.uniform(k2, (4 * hidden_size, hidden_size),
                                  jnp.float32, -bound, bound)
        b_ih = jax.random.uniform(k3, (4 * hidden_size,),
                                  jnp.float32, -bound, bound)
        b_hh = jax.random.uniform(k4, (4 * hidden_size,),
                                  jnp.float32, -bound, bound)
        params.append((w_ih, w_hh, b_ih, b_hh))
    return params


def lstm_forward_ref(x, params):
    """Pure-JAX f32 reference for correctness checking."""
    def step(carry, xt, w_ih, w_hh, b):
        h, c = carry
        gates = xt @ w_ih.T + h @ w_hh.T + b
        H = h.shape[-1]
        i = jax.nn.sigmoid(gates[:, 0 * H:1 * H])
        f = jax.nn.sigmoid(gates[:, 1 * H:2 * H])
        g = jnp.tanh(gates[:, 2 * H:3 * H])
        o = jax.nn.sigmoid(gates[:, 3 * H:4 * H])
        c = f * c + i * g
        h = o * jnp.tanh(c)
        return (h, c), h

    out = x
    for (w_ih, w_hh, b_ih, b_hh) in params:
        H = w_hh.shape[1]
        B = out.shape[1]
        b = b_ih + b_hh
        carry = (jnp.zeros((B, H), jnp.float32), jnp.zeros((B, H), jnp.float32))
        (carry, ys) = jax.lax.scan(
            lambda c, xt: step(c, xt, w_ih, w_hh, b), carry, out)
        out = ys
    return out


if __name__ == "__main__":
    # Shapes implied by the module: seq=8, batch=2, input_size=16,
    # output_size (hidden) = 32, model_type 'm' -> num_layers = 2.
    SEQ, BATCH, INPUT_SIZE, HIDDEN, NUM_LAYERS = 8, 2, 16, 32, 2

    key = jax.random.PRNGKey(0)
    kx, kp = jax.random.split(key)
    x = jax.random.normal(kx, (SEQ, BATCH, INPUT_SIZE), jnp.float32)

    params = init_lstm_params(kp, INPUT_SIZE, HIDDEN, NUM_LAYERS)

    y = jax.block_until_ready(lstm_forward(x, params))
    y_ref = lstm_forward_ref(x, params)

    assert y.shape == (SEQ, BATCH, HIDDEN), y.shape
    # Matmuls use bf16 operands (f32 accumulation); elementwise math is f32,
    # so compare against the pure-f32 reference with a relaxed tolerance.
    max_err = float(jnp.max(jnp.abs(y - y_ref)))
    assert max_err < 3e-2, max_err
    print("KERNEL_OK")
</pallas_src>

<mosaic_0001>
module attributes {stable_mosaic.version = 11 : i64} {
  func.func @_fused_lstm_kernel(%arg0: i32, %arg1: memref<64x128xf32, #tpu.memory_space<vmem>>, %arg2: memref<32x128xbf16, #tpu.memory_space<vmem>>, %arg3: memref<32x128xbf16, #tpu.memory_space<vmem>>, %arg4: memref<32x128xbf16, #tpu.memory_space<vmem>>, %arg5: memref<1x128xf32, #tpu.memory_space<vmem>>, %arg6: memref<64x32xf32, #tpu.memory_space<vmem>>, %arg7: memref<64x128xf32, #tpu.memory_space<vmem>>, %arg8: memref<2x8x32xf32, #tpu.memory_space<vmem>>, %arg9: memref<2x8x32xf32, #tpu.memory_space<vmem>>) attributes {dimension_semantics = [#tpu.dimension_semantics<arbitrary>], iteration_bounds = array<i64: 1>, scalar_prefetch = 0 : i64, scratch_operands = 3 : i64, tpu.core_type = #tpu.core_type<tc>, window_params = [{transform_indices = @transform_0, window_bounds = array<i64: 64, 128>}, {pipeline_mode = #tpu.pipeline_mode<synchronous>, transform_indices = @transform_1, window_bounds = array<i64: 32, 128>}, {pipeline_mode = #tpu.pipeline_mode<synchronous>, transform_indices = @transform_2, window_bounds = array<i64: 32, 128>}, {pipeline_mode = #tpu.pipeline_mode<synchronous>, transform_indices = @transform_3, window_bounds = array<i64: 32, 128>}, {pipeline_mode = #tpu.pipeline_mode<synchronous>, transform_indices = @transform_4, window_bounds = array<i64: 1, 128>}, {transform_indices = @transform_5, window_bounds = array<i64: 64, 32>}]} {
    %c0_i32 = arith.constant 0 : i32
    %0 = arith.cmpi eq, %arg0, %c0_i32 : i32
    %1 = arith.extui %0 : i1 to i32
    %c0_i32_0 = arith.constant 0 : i32
    %2 = arith.cmpi ne, %1, %c0_i32_0 : i32
    scf.if %2 {
      %cst_293 = arith.constant 0.000000e+00 : f32
      %557 = vector.broadcast %cst_293 : f32 to vector<2x8x32xf32>
      %c0_294 = arith.constant 0 : index
      %c0_295 = arith.constant 0 : index
      %c0_296 = arith.constant 0 : index
      %558 = vector.load %arg8[%c0_294, %c0_295, %c0_296] : memref<2x8x32xf32, #tpu.memory_space<vmem>>, vector<2x8x32xf32>
      tpu.vector_store %arg8[%c0_294, %c0_295, %c0_296], %557 {strides = array<i32>} : memref<2x8x32xf32, #tpu.memory_space<vmem>>, vector<2x8x32xf32>,
      %cst_297 = arith.constant 0.000000e+00 : f32
      %559 = vector.broadcast %cst_297 : f32 to vector<2x8x32xf32>
      %c0_298 = arith.constant 0 : index
      %c0_299 = arith.constant 0 : index
      %c0_300 = arith.constant 0 : index
      %560 = vector.load %arg9[%c0_298, %c0_299, %c0_300] : memref<2x8x32xf32, #tpu.memory_space<vmem>>, vector<2x8x32xf32>
      tpu.vector_store %arg9[%c0_298, %c0_299, %c0_300], %559 {strides = array<i32>} : memref<2x8x32xf32, #tpu.memory_space<vmem>>, vector<2x8x32xf32>,
    } else {
    }
    %c0 = arith.constant 0 : index
    %c0_1 = arith.constant 0 : index
    %3 = vector.load %arg2[%c0, %c0_1] : memref<32x128xbf16, #tpu.memory_space<vmem>>, vector<32x128xbf16>
    %c0_i32_2 = arith.constant 0 : i32
    %c8_i32 = arith.constant 8 : i32
    %4 = arith.muli %c0_i32_2, %c8_i32 : i32
    %5 = tpu.assume_multiple %4, 8 : i32
    %6 = arith.index_cast %5 : i32 to index
    %c0_3 = arith.constant 0 : index
    %7 = vector.load %arg1[%6, %c0_3] : memref<64x128xf32, #tpu.memory_space<vmem>>, vector<8x128xf32>
    %c0_4 = arith.constant 0 : index
    %c0_5 = arith.constant 0 : index
    %c0_6 = arith.constant 0 : index
    %8 = vector.load %arg8[%c0_4, %c0_5, %c0_6] : memref<2x8x32xf32, #tpu.memory_space<vmem>>, vector<1x8x32xf32>
    %9 = vector.shape_cast %8 : vector<1x8x32xf32> to vector<8x32xf32>
    %c0_7 = arith.constant 0 : index
    %c0_8 = arith.constant 0 : index
    %c0_9 = arith.constant 0 : index
    %10 = vector.load %arg9[%c0_7, %c0_8, %c0_9] : memref<2x8x32xf32, #tpu.memory_space<vmem>>, vector<1x8x32xf32>
    %11 = vector.shape_cast %10 : vector<1x8x32xf32> to vector<8x32xf32>
    %12 = arith.truncf %9 : vector<8x32xf32> to vector<8x32xbf16>
    %cst = arith.constant dense<0.000000e+00> : vector<8x128xf32>
    %13 = tpu.matmul %12, %3, %cst {dimension_numbers = #tpu.dot_dimension_numbers<[1], [0], [0], [1], [0, 0, 1, 1], [], []>} : vector<8x32xbf16>, vector<32x128xbf16>, vector<8x128xf32> -> vector<8x128xf32>
    %14 = arith.addf %7, %13 : vector<8x128xf32>
    %15 = arith.negf %14 : vector<8x128xf32>
    %16 = math.exp %15 : vector<8x128xf32>
    %cst_10 = arith.constant 1.000000e+00 : f32
    %17 = vector.broadcast %cst_10 : f32 to vector<8x128xf32>
    %18 = arith.addf %17, %16 : vector<8x128xf32>
    %19 = arith.divf %17, %18 : vector<8x128xf32>
    %20 = math.tanh %14 : vector<8x128xf32>
    %21 = vector.extract_strided_slice %19 {offsets = [0, 0], sizes = [8, 32], strides = [1, 1]} : vector<8x128xf32> to vector<8x32xf32>
    %22 = vector.extract_strided_slice %19 {offsets = [0, 32], sizes = [8, 32], strides = [1, 1]} : vector<8x128xf32> to vector<8x32xf32>
    %23 = vector.extract_strided_slice %20 {offsets = [0, 64], sizes = [8, 32], strides = [1, 1]} : vector<8x128xf32> to vector<8x32xf32>
    %24 = vector.extract_strided_slice %19 {offsets = [0, 96], sizes = [8, 32], strides = [1, 1]} : vector<8x128xf32> to vector<8x32xf32>
    %25 = arith.mulf %22, %11 : vector<8x32xf32>
    %26 = arith.mulf %21, %23 : vector<8x32xf32>
    %27 = arith.addf %25, %26 : vector<8x32xf32>
    %28 = math.tanh %27 : vector<8x32xf32>
    %29 = arith.mulf %24, %28 : vector<8x32xf32>
    %c0_11 = arith.constant 0 : index
    %c0_12 = arith.constant 0 : index
    %c0_13 = arith.constant 0 : index
    %30 = vector.load %arg9[%c0_11, %c0_12, %c0_13] : memref<2x8x32xf32, #tpu.memory_space<vmem>>, vector<1x8x32xf32>
    %31 = vector.shape_cast %30 : vector<1x8x32xf32> to vector<8x32xf32>
    %32 = vector.shape_cast %27 : vector<8x32xf32> to vector<1x8x32xf32>
    tpu.vector_store %arg9[%c0_11, %c0_12, %c0_13], %32 {strides = array<i32>} : memref<2x8x32xf32, #tpu.memory_space<vmem>>, vector<1x8x32xf32>,
    %c0_14 = arith.constant 0 : index
    %c0_15 = arith.constant 0 : index
    %c0_16 = arith.constant 0 : index
    %33 = vector.load %arg8[%c0_14, %c0_15, %c0_16] : memref<2x8x32xf32, #tpu.memory_space<vmem>>, vector<1x8x32xf32>
    %34 = vector.shape_cast %33 : vector<1x8x32xf32> to vector<8x32xf32>
    %35 = vector.shape_cast %29 : vector<8x32xf32> to vector<1x8x32xf32>
    tpu.vector_store %arg8[%c0_14, %c0_15, %c0_16], %35 {strides = array<i32>} : memref<2x8x32xf32, #tpu.memory_space<vmem>>, vector<1x8x32xf32>,
    %36 = arith.index_cast %5 : i32 to index
    %c0_17 = arith.constant 0 : index
    %37 = vector.load %arg6[%36, %c0_17] : memref<64x32xf32, #tpu.memory_space<vmem>>, vector<8x32xf32>
    tpu.vector_store %arg6[%36, %c0_17], %29 {strides = array<i32>} : memref<64x32xf32, #tpu.memory_space<vmem>>, vector<8x32xf32>,
    %c1_i32 = arith.constant 1 : i32
    %c8_i32_18 = arith.constant 8 : i32
    %38 = arith.muli %c1_i32, %c8_i32_18 : i32
    %39 = tpu.assume_multiple %38, 8 : i32
    %40 = arith.index_cast %39 : i32 to index
    %c0_19 = arith.constant 0 : index
    %41 = vector.load %arg1[%40, %c0_19] : memref<64x128xf32, #tpu.memory_space<vmem>>, vector<8x128xf32>
    %c0_20 = arith.constant 0 : index
    %c0_21 = arith.constant 0 : index
    %c0_22 = arith.constant 0 : index
    %42 = vector.load %arg8[%c0_20, %c0_21, %c0_22] : memref<2x8x32xf32, #tpu.memory_space<vmem>>, vector<1x8x32xf32>
    %43 = vector.shape_cast %42 : vector<1x8x32xf32> to vector<8x32xf32>
    %c0_23 = arith.constant 0 : index
    %c0_24 = arith.constant 0 : index
    %c0_25 = arith.constant 0 : index
    %44 = vector.load %arg9[%c0_23, %c0_24, %c0_25] : memref<2x8x32xf32, #tpu.memory_space<vmem>>, vector<1x8x32xf32>
    %45 = vector.shape_cast %44 : vector<1x8x32xf32> to vector<8x32xf32>
    %46 = arith.truncf %43 : vector<8x32xf32> to vector<8x32xbf16>
    %cst_26 = arith.constant dense<0.000000e+00> : vector<8x128xf32>
    %47 = tpu.matmul %46, %3, %cst_26 {dimension_numbers = #tpu.dot_dimension_numbers<[1], [0], [0], [1], [0, 0, 1, 1], [], []>} : vector<8x32xbf16>, vector<32x128xbf16>, vector<8x128xf32> -> vector<8x128xf32>
    %48 = arith.addf %41, %47 : vector<8x128xf32>
    %49 = arith.negf %48 : vector<8x128xf32>
    %50 = math.exp %49 : vector<8x128xf32>
    %cst_27 = arith.constant 1.000000e+00 : f32
    %51 = vector.broadcast %cst_27 : f32 to vector<8x128xf32>
    %52 = arith.addf %51, %50 : vector<8x128xf32>
    %53 = arith.divf %51, %52 : vector<8x128xf32>
    %54 = math.tanh %48 : vector<8x128xf32>
    %55 = vector.extract_strided_slice %53 {offsets = [0, 0], sizes = [8, 32], strides = [1, 1]} : vector<8x128xf32> to vector<8x32xf32>
    %56 = vector.extract_strided_slice %53 {offsets = [0, 32], sizes = [8, 32], strides = [1, 1]} : vector<8x128xf32> to vector<8x32xf32>
    %57 = vector.extract_strided_slice %54 {offsets = [0, 64], sizes = [8, 32], strides = [1, 1]} : vector<8x128xf32> to vector<8x32xf32>
    %58 = vector.extract_strided_slice %53 {offsets = [0, 96], sizes = [8, 32], strides = [1, 1]} : vector<8x128xf32> to vector<8x32xf32>
    %59 = arith.mulf %56, %45 : vector<8x32xf32>
    %60 = arith.mulf %55, %57 : vector<8x32xf32>
    %61 = arith.addf %59, %60 : vector<8x32xf32>
    %62 = math.tanh %61 : vector<8x32xf32>
    %63 = arith.mulf %58, %62 : vector<8x32xf32>
    %c0_28 = arith.constant 0 : index
    %c0_29 = arith.constant 0 : index
    %c0_30 = arith.constant 0 : index
    %64 = vector.load %arg9[%c0_28, %c0_29, %c0_30] : memref<2x8x32xf32, #tpu.memory_space<vmem>>, vector<1x8x32xf32>
    %65 = vector.shape_cast %64 : vector<1x8x32xf32> to vector<8x32xf32>
    %66 = vector.shape_cast %61 : vector<8x32xf32> to vector<1x8x32xf32>
    tpu.vector_store %arg9[%c0_28, %c0_29, %c0_30], %66 {strides = array<i32>} : memref<2x8x32xf32, #tpu.memory_space<vmem>>, vector<1x8x32xf32>,
    %c0_31 = arith.constant 0 : index
    %c0_32 = arith.constant 0 : index
    %c0_33 = arith.constant 0 : index
    %67 = vector.load %arg8[%c0_31, %c0_32, %c0_33] : memref<2x8x32xf32, #tpu.memory_space<vmem>>, vector<1x8x32xf32>
    %68 = vector.shape_cast %67 : vector<1x8x32xf32> to vector<8x32xf32>
    %69 = vector.shape_cast %63 : vector<8x32xf32> to vector<1x8x32xf32>
    tpu.vector_store %arg8[%c0_31, %c0_32, %c0_33], %69 {strides = array<i32>} : memref<2x8x32xf32, #tpu.memory_space<vmem>>, vector<1x8x32xf32>,
    %70 = arith.index_cast %39 : i32 to index
    %c0_34 = arith.constant 0 : index
    %71 = vector.load %arg6[%70, %c0_34] : memref<64x32xf32, #tpu.memory_space<vmem>>, vector<8x32xf32>
    tpu.vector_store %arg6[%70, %c0_34], %63 {strides = array<i32>} : memref<64x32xf32, #tpu.memory_space<vmem>>, vector<8x32xf32>,
    %c2_i32 = arith.constant 2 : i32
    %c8_i32_35 = arith.constant 8 : i32
    %72 = arith.muli %c2_i32, %c8_i32_35 : i32
    %73 = tpu.assume_multiple %72, 8 : i32
    %74 = arith.index_cast %73 : i32 to index
    %c0_36 = arith.constant 0 : index
    %75 = vector.load %arg1[%74, %c0_36] : memref<64x128xf32, #tpu.memory_space<vmem>>, vector<8x128xf32>
    %c0_37 = arith.constant 0 : index
    %c0_38 = arith.constant 0 : index
    %c0_39 = arith.constant 0 : index
    %76 = vector.load %arg8[%c0_37, %c0_38, %c0_39] : memref<2x8x32xf32, #tpu.memory_space<vmem>>, vector<1x8x32xf32>
    %77 = vector.shape_cast %76 : vector<1x8x32xf32> to vector<8x32xf32>
    %c0_40 = arith.constant 0 : index
    %c0_41 = arith.constant 0 : index
    %c0_42 = arith.constant 0 : index
    %78 = vector.load %arg9[%c0_40, %c0_41, %c0_42] : memref<2x8x32xf32, #tpu.memory_space<vmem>>, vector<1x8x32xf32>
    %79 = vector.shape_cast %78 : vector<1x8x32xf32> to vector<8x32xf32>
    %80 = arith.truncf %77 : vector<8x32xf32> to vector<8x32xbf16>
    %cst_43 = arith.constant dense<0.000000e+00> : vector<8x128xf32>
    %81 = tpu.matmul %80, %3, %cst_43 {dimension_numbers = #tpu.dot_dimension_numbers<[1], [0], [0], [1], [0, 0, 1, 1], [], []>} : vector<8x32xbf16>, vector<32x128xbf16>, vector<8x128xf32> -> vector<8x128xf32>
    %82 = arith.addf %75, %81 : vector<8x128xf32>
    %83 = arith.negf %82 : vector<8x128xf32>
    %84 = math.exp %83 : vector<8x128xf32>
    %cst_44 = arith.constant 1.000000e+00 : f32
    %85 = vector.broadcast %cst_44 : f32 to vector<8x128xf32>
    %86 = arith.addf %85, %84 : vector<8x128xf32>
    %87 = arith.divf %85, %86 : vector<8x128xf32>
    %88 = math.tanh %82 : vector<8x128xf32>
    %89 = vector.extract_strided_slice %87 {offsets = [0, 0], sizes = [8, 32], strides = [1, 1]} : vector<8x128xf32> to vector<8x32xf32>
    %90 = vector.extract_strided_slice %87 {offsets = [0, 32], sizes = [8, 32], strides = [1, 1]} : vector<8x128xf32> to vector<8x32xf32>
    %91 = vector.extract_strided_slice %88 {offsets = [0, 64], sizes = [8, 32], strides = [1, 1]} : vector<8x128xf32> to vector<8x32xf32>
    %92 = vector.extract_strided_slice %87 {offsets = [0, 96], sizes = [8, 32], strides = [1, 1]} : vector<8x128xf32> to vector<8x32xf32>
    %93 = arith.mulf %90, %79 : vector<8x32xf32>
    %94 = arith.mulf %89, %91 : vector<8x32xf32>
    %95 = arith.addf %93, %94 : vector<8x32xf32>
    %96 = math.tanh %95 : vector<8x32xf32>
    %97 = arith.mulf %92, %96 : vector<8x32xf32>
    %c0_45 = arith.constant 0 : index
    %c0_46 = arith.constant 0 : index
    %c0_47 = arith.constant 0 : index
    %98 = vector.load %arg9[%c0_45, %c0_46, %c0_47] : memref<2x8x32xf32, #tpu.memory_space<vmem>>, vector<1x8x32xf32>
    %99 = vector.shape_cast %98 : vector<1x8x32xf32> to vector<8x32xf32>
    %100 = vector.shape_cast %95 : vector<8x32xf32> to vector<1x8x32xf32>
    tpu.vector_store %arg9[%c0_45, %c0_46, %c0_47], %100 {strides = array<i32>} : memref<2x8x32xf32, #tpu.memory_space<vmem>>, vector<1x8x32xf32>,
    %c0_48 = arith.constant 0 : index
    %c0_49 = arith.constant 0 : index
    %c0_50 = arith.constant 0 : index
    %101 = vector.load %arg8[%c0_48, %c0_49, %c0_50] : memref<2x8x32xf32, #tpu.memory_space<vmem>>, vector<1x8x32xf32>
    %102 = vector.shape_cast %101 : vector<1x8x32xf32> to vector<8x32xf32>
    %103 = vector.shape_cast %97 : vector<8x32xf32> to vector<1x8x32xf32>
    tpu.vector_store %arg8[%c0_48, %c0_49, %c0_50], %103 {strides = array<i32>} : memref<2x8x32xf32, #tpu.memory_space<vmem>>, vector<1x8x32xf32>,
    %104 = arith.index_cast %73 : i32 to index
    %c0_51 = arith.constant 0 : index
    %105 = vector.load %arg6[%104, %c0_51] : memref<64x32xf32, #tpu.memory_space<vmem>>, vector<8x32xf32>
    tpu.vector_store %arg6[%104, %c0_51], %97 {strides = array<i32>} : memref<64x32xf32, #tpu.memory_space<vmem>>, vector<8x32xf32>,
    %c3_i32 = arith.constant 3 : i32
    %c8_i32_52 = arith.constant 8 : i32
    %106 = arith.muli %c3_i32, %c8_i32_52 : i32
    %107 = tpu.assume_multiple %106, 8 : i32
    %108 = arith.index_cast %107 : i32 to index
    %c0_53 = arith.constant 0 : index
    %109 = vector.load %arg1[%108, %c0_53] : memref<64x128xf32, #tpu.memory_space<vmem>>, vector<8x128xf32>
    %c0_54 = arith.constant 0 : index
    %c0_55 = arith.constant 0 : index
    %c0_56 = arith.constant 0 : index
    %110 = vector.load %arg8[%c0_54, %c0_55, %c0_56] : memref<2x8x32xf32, #tpu.memory_space<vmem>>, vector<1x8x32xf32>
    %111 = vector.shape_cast %110 : vector<1x8x32xf32> to vector<8x32xf32>
    %c0_57 = arith.constant 0 : index
    %c0_58 = arith.constant 0 : index
    %c0_59 = arith.constant 0 : index
    %112 = vector.load %arg9[%c0_57, %c0_58, %c0_59] : memref<2x8x32xf32, #tpu.memory_space<vmem>>, vector<1x8x32xf32>
    %113 = vector.shape_cast %112 : vector<1x8x32xf32> to vector<8x32xf32>
    %114 = arith.truncf %111 : vector<8x32xf32> to vector<8x32xbf16>
    %cst_60 = arith.constant dense<0.000000e+00> : vector<8x128xf32>
    %115 = tpu.matmul %114, %3, %cst_60 {dimension_numbers = #tpu.dot_dimension_numbers<[1], [0], [0], [1], [0, 0, 1, 1], [], []>} : vector<8x32xbf16>, vector<32x128xbf16>, vector<8x128xf32> -> vector<8x128xf32>
    %116 = arith.addf %109, %115 : vector<8x128xf32>
    %117 = arith.negf %116 : vector<8x128xf32>
    %118 = math.exp %117 : vector<8x128xf32>
    %cst_61 = arith.constant 1.000000e+00 : f32
    %119 = vector.broadcast %cst_61 : f32 to vector<8x128xf32>
    %120 = arith.addf %119, %118 : vector<8x128xf32>
    %121 = arith.divf %119, %120 : vector<8x128xf32>
    %122 = math.tanh %116 : vector<8x128xf32>
    %123 = vector.extract_strided_slice %121 {offsets = [0, 0], sizes = [8, 32], strides = [1, 1]} : vector<8x128xf32> to vector<8x32xf32>
    %124 = vector.extract_strided_slice %121 {offsets = [0, 32], sizes = [8, 32], strides = [1, 1]} : vector<8x128xf32> to vector<8x32xf32>
    %125 = vector.extract_strided_slice %122 {offsets = [0, 64], sizes = [8, 32], strides = [1, 1]} : vector<8x128xf32> to vector<8x32xf32>
    %126 = vector.extract_strided_slice %121 {offsets = [0, 96], sizes = [8, 32], strides = [1, 1]} : vector<8x128xf32> to vector<8x32xf32>
    %127 = arith.mulf %124, %113 : vector<8x32xf32>
    %128 = arith.mulf %123, %125 : vector<8x32xf32>
    %129 = arith.addf %127, %128 : vector<8x32xf32>
    %130 = math.tanh %129 : vector<8x32xf32>
    %131 = arith.mulf %126, %130 : vector<8x32xf32>
    %c0_62 = arith.constant 0 : index
    %c0_63 = arith.constant 0 : index
    %c0_64 = arith.constant 0 : index
    %132 = vector.load %arg9[%c0_62, %c0_63, %c0_64] : memref<2x8x32xf32, #tpu.memory_space<vmem>>, vector<1x8x32xf32>
    %133 = vector.shape_cast %132 : vector<1x8x32xf32> to vector<8x32xf32>
    %134 = vector.shape_cast %129 : vector<8x32xf32> to vector<1x8x32xf32>
    tpu.vector_store %arg9[%c0_62, %c0_63, %c0_64], %134 {strides = array<i32>} : memref<2x8x32xf32, #tpu.memory_space<vmem>>, vector<1x8x32xf32>,
    %c0_65 = arith.constant 0 : index
    %c0_66 = arith.constant 0 : index
    %c0_67 = arith.constant 0 : index
    %135 = vector.load %arg8[%c0_65, %c0_66, %c0_67] : memref<2x8x32xf32, #tpu.memory_space<vmem>>, vector<1x8x32xf32>
    %136 = vector.shape_cast %135 : vector<1x8x32xf32> to vector<8x32xf32>
    %137 = vector.shape_cast %131 : vector<8x32xf32> to vector<1x8x32xf32>
    tpu.vector_store %arg8[%c0_65, %c0_66, %c0_67], %137 {strides = array<i32>} : memref<2x8x32xf32, #tpu.memory_space<vmem>>, vector<1x8x32xf32>,
    %138 = arith.index_cast %107 : i32 to index
    %c0_68 = arith.constant 0 : index
    %139 = vector.load %arg6[%138, %c0_68] : memref<64x32xf32, #tpu.memory_space<vmem>>, vector<8x32xf32>
    tpu.vector_store %arg6[%138, %c0_68], %131 {strides = array<i32>} : memref<64x32xf32, #tpu.memory_space<vmem>>, vector<8x32xf32>,
    %c4_i32 = arith.constant 4 : i32
    %c8_i32_69 = arith.constant 8 : i32
    %140 = arith.muli %c4_i32, %c8_i32_69 : i32
    %141 = tpu.assume_multiple %140, 8 : i32
    %142 = arith.index_cast %141 : i32 to index
    %c0_70 = arith.constant 0 : index
    %143 = vector.load %arg1[%142, %c0_70] : memref<64x128xf32, #tpu.memory_space<vmem>>, vector<8x128xf32>
    %c0_71 = arith.constant 0 : index
    %c0_72 = arith.constant 0 : index
    %c0_73 = arith.constant 0 : index
    %144 = vector.load %arg8[%c0_71, %c0_72, %c0_73] : memref<2x8x32xf32, #tpu.memory_space<vmem>>, vector<1x8x32xf32>
    %145 = vector.shape_cast %144 : vector<1x8x32xf32> to vector<8x32xf32>
    %c0_74 = arith.constant 0 : index
    %c0_75 = arith.constant 0 : index
    %c0_76 = arith.constant 0 : index
    %146 = vector.load %arg9[%c0_74, %c0_75, %c0_76] : memref<2x8x32xf32, #tpu.memory_space<vmem>>, vector<1x8x32xf32>
    %147 = vector.shape_cast %146 : vector<1x8x32xf32> to vector<8x32xf32>
    %148 = arith.truncf %145 : vector<8x32xf32> to vector<8x32xbf16>
    %cst_77 = arith.constant dense<0.000000e+00> : vector<8x128xf32>
    %149 = tpu.matmul %148, %3, %cst_77 {dimension_numbers = #tpu.dot_dimension_numbers<[1], [0], [0], [1], [0, 0, 1, 1], [], []>} : vector<8x32xbf16>, vector<32x128xbf16>, vector<8x128xf32> -> vector<8x128xf32>
    %150 = arith.addf %143, %149 : vector<8x128xf32>
    %151 = arith.negf %150 : vector<8x128xf32>
    %152 = math.exp %151 : vector<8x128xf32>
    %cst_78 = arith.constant 1.000000e+00 : f32
    %153 = vector.broadcast %cst_78 : f32 to vector<8x128xf32>
    %154 = arith.addf %153, %152 : vector<8x128xf32>
    %155 = arith.divf %153, %154 : vector<8x128xf32>
    %156 = math.tanh %150 : vector<8x128xf32>
    %157 = vector.extract_strided_slice %155 {offsets = [0, 0], sizes = [8, 32], strides = [1, 1]} : vector<8x128xf32> to vector<8x32xf32>
    %158 = vector.extract_strided_slice %155 {offsets = [0, 32], sizes = [8, 32], strides = [1, 1]} : vector<8x128xf32> to vector<8x32xf32>
    %159 = vector.extract_strided_slice %156 {offsets = [0, 64], sizes = [8, 32], strides = [1, 1]} : vector<8x128xf32> to vector<8x32xf32>
    %160 = vector.extract_strided_slice %155 {offsets = [0, 96], sizes = [8, 32], strides = [1, 1]} : vector<8x128xf32> to vector<8x32xf32>
    %161 = arith.mulf %158, %147 : vector<8x32xf32>
    %162 = arith.mulf %157, %159 : vector<8x32xf32>
    %163 = arith.addf %161, %162 : vector<8x32xf32>
    %164 = math.tanh %163 : vector<8x32xf32>
    %165 = arith.mulf %160, %164 : vector<8x32xf32>
    %c0_79 = arith.constant 0 : index
    %c0_80 = arith.constant 0 : index
    %c0_81 = arith.constant 0 : index
    %166 = vector.load %arg9[%c0_79, %c0_80, %c0_81] : memref<2x8x32xf32, #tpu.memory_space<vmem>>, vector<1x8x32xf32>
    %167 = vector.shape_cast %166 : vector<1x8x32xf32> to vector<8x32xf32>
    %168 = vector.shape_cast %163 : vector<8x32xf32> to vector<1x8x32xf32>
    tpu.vector_store %arg9[%c0_79, %c0_80, %c0_81], %168 {strides = array<i32>} : memref<2x8x32xf32, #tpu.memory_space<vmem>>, vector<1x8x32xf32>,
    %c0_82 = arith.constant 0 : index
    %c0_83 = arith.constant 0 : index
    %c0_84 = arith.constant 0 : index
    %169 = vector.load %arg8[%c0_82, %c0_83, %c0_84] : memref<2x8x32xf32, #tpu.memory_space<vmem>>, vector<1x8x32xf32>
    %170 = vector.shape_cast %169 : vector<1x8x32xf32> to vector<8x32xf32>
    %171 = vector.shape_cast %165 : vector<8x32xf32> to vector<1x8x32xf32>
    tpu.vector_store %arg8[%c0_82, %c0_83, %c0_84], %171 {strides = array<i32>} : memref<2x8x32xf32, #tpu.memory_space<vmem>>, vector<1x8x32xf32>,
    %172 = arith.index_cast %141 : i32 to index
    %c0_85 = arith.constant 0 : index
    %173 = vector.load %arg6[%172, %c0_85] : memref<64x32xf32, #tpu.memory_space<vmem>>, vector<8x32xf32>
    tpu.vector_store %arg6[%172, %c0_85], %165 {strides = array<i32>} : memref<64x32xf32, #tpu.memory_space<vmem>>, vector<8x32xf32>,
    %c5_i32 = arith.constant 5 : i32
    %c8_i32_86 = arith.constant 8 : i32
    %174 = arith.muli %c5_i32, %c8_i32_86 : i32
    %175 = tpu.assume_multiple %174, 8 : i32
    %176 = arith.index_cast %175 : i32 to index
    %c0_87 = arith.constant 0 : index
    %177 = vector.load %arg1[%176, %c0_87] : memref<64x128xf32, #tpu.memory_space<vmem>>, vector<8x128xf32>
    %c0_88 = arith.constant 0 : index
    %c0_89 = arith.constant 0 : index
    %c0_90 = arith.constant 0 : index
    %178 = vector.load %arg8[%c0_88, %c0_89, %c0_90] : memref<2x8x32xf32, #tpu.memory_space<vmem>>, vector<1x8x32xf32>
    %179 = vector.shape_cast %178 : vector<1x8x32xf32> to vector<8x32xf32>
    %c0_91 = arith.constant 0 : index
    %c0_92 = arith.constant 0 : index
    %c0_93 = arith.constant 0 : index
    %180 = vector.load %arg9[%c0_91, %c0_92, %c0_93] : memref<2x8x32xf32, #tpu.memory_space<vmem>>, vector<1x8x32xf32>
    %181 = vector.shape_cast %180 : vector<1x8x32xf32> to vector<8x32xf32>
    %182 = arith.truncf %179 : vector<8x32xf32> to vector<8x32xbf16>
    %cst_94 = arith.constant dense<0.000000e+00> : vector<8x128xf32>
    %183 = tpu.matmul %182, %3, %cst_94 {dimension_numbers = #tpu.dot_dimension_numbers<[1], [0], [0], [1], [0, 0, 1, 1], [], []>} : vector<8x32xbf16>, vector<32x128xbf16>, vector<8x128xf32> -> vector<8x128xf32>
    %184 = arith.addf %177, %183 : vector<8x128xf32>
    %185 = arith.negf %184 : vector<8x128xf32>
    %186 = math.exp %185 : vector<8x128xf32>
    %cst_95 = arith.constant 1.000000e+00 : f32
    %187 = vector.broadcast %cst_95 : f32 to vector<8x128xf32>
    %188 = arith.addf %187, %186 : vector<8x128xf32>
    %189 = arith.divf %187, %188 : vector<8x128xf32>
    %190 = math.tanh %184 : vector<8x128xf32>
    %191 = vector.extract_strided_slice %189 {offsets = [0, 0], sizes = [8, 32], strides = [1, 1]} : vector<8x128xf32> to vector<8x32xf32>
    %192 = vector.extract_strided_slice %189 {offsets = [0, 32], sizes = [8, 32], strides = [1, 1]} : vector<8x128xf32> to vector<8x32xf32>
    %193 = vector.extract_strided_slice %190 {offsets = [0, 64], sizes = [8, 32], strides = [1, 1]} : vector<8x128xf32> to vector<8x32xf32>
    %194 = vector.extract_strided_slice %189 {offsets = [0, 96], sizes = [8, 32], strides = [1, 1]} : vector<8x128xf32> to vector<8x32xf32>
    %195 = arith.mulf %192, %181 : vector<8x32xf32>
    %196 = arith.mulf %191, %193 : vector<8x32xf32>
    %197 = arith.addf %195, %196 : vector<8x32xf32>
    %198 = math.tanh %197 : vector<8x32xf32>
    %199 = arith.mulf %194, %198 : vector<8x32xf32>
    %c0_96 = arith.constant 0 : index
    %c0_97 = arith.constant 0 : index
    %c0_98 = arith.constant 0 : index
    %200 = vector.load %arg9[%c0_96, %c0_97, %c0_98] : memref<2x8x32xf32, #tpu.memory_space<vmem>>, vector<1x8x32xf32>
    %201 = vector.shape_cast %200 : vector<1x8x32xf32> to vector<8x32xf32>
    %202 = vector.shape_cast %197 : vector<8x32xf32> to vector<1x8x32xf32>
    tpu.vector_store %arg9[%c0_96, %c0_97, %c0_98], %202 {strides = array<i32>} : memref<2x8x32xf32, #tpu.memory_space<vmem>>, vector<1x8x32xf32>,
    %c0_99 = arith.constant 0 : index
    %c0_100 = arith.constant 0 : index
    %c0_101 = arith.constant 0 : index
    %203 = vector.load %arg8[%c0_99, %c0_100, %c0_101] : memref<2x8x32xf32, #tpu.memory_space<vmem>>, vector<1x8x32xf32>
    %204 = vector.shape_cast %203 : vector<1x8x32xf32> to vector<8x32xf32>
    %205 = vector.shape_cast %199 : vector<8x32xf32> to vector<1x8x32xf32>
    tpu.vector_store %arg8[%c0_99, %c0_100, %c0_101], %205 {strides = array<i32>} : memref<2x8x32xf32, #tpu.memory_space<vmem>>, vector<1x8x32xf32>,
    %206 = arith.index_cast %175 : i32 to index
    %c0_102 = arith.constant 0 : index
    %207 = vector.load %arg6[%206, %c0_102] : memref<64x32xf32, #tpu.memory_space<vmem>>, vector<8x32xf32>
    tpu.vector_store %arg6[%206, %c0_102], %199 {strides = array<i32>} : memref<64x32xf32, #tpu.memory_space<vmem>>, vector<8x32xf32>,
    %c6_i32 = arith.constant 6 : i32
    %c8_i32_103 = arith.constant 8 : i32
    %208 = arith.muli %c6_i32, %c8_i32_103 : i32
    %209 = tpu.assume_multiple %208, 8 : i32
    %210 = arith.index_cast %209 : i32 to index
    %c0_104 = arith.constant 0 : index
    %211 = vector.load %arg1[%210, %c0_104] : memref<64x128xf32, #tpu.memory_space<vmem>>, vector<8x128xf32>
    %c0_105 = arith.constant 0 : index
    %c0_106 = arith.constant 0 : index
    %c0_107 = arith.constant 0 : index
    %212 = vector.load %arg8[%c0_105, %c0_106, %c0_107] : memref<2x8x32xf32, #tpu.memory_space<vmem>>, vector<1x8x32xf32>
    %213 = vector.shape_cast %212 : vector<1x8x32xf32> to vector<8x32xf32>
    %c0_108 = arith.constant 0 : index
    %c0_109 = arith.constant 0 : index
    %c0_110 = arith.constant 0 : index
    %214 = vector.load %arg9[%c0_108, %c0_109, %c0_110] : memref<2x8x32xf32, #tpu.memory_space<vmem>>, vector<1x8x32xf32>
    %215 = vector.shape_cast %214 : vector<1x8x32xf32> to vector<8x32xf32>
    %216 = arith.truncf %213 : vector<8x32xf32> to vector<8x32xbf16>
    %cst_111 = arith.constant dense<0.000000e+00> : vector<8x128xf32>
    %217 = tpu.matmul %216, %3, %cst_111 {dimension_numbers = #tpu.dot_dimension_numbers<[1], [0], [0], [1], [0, 0, 1, 1], [], []>} : vector<8x32xbf16>, vector<32x128xbf16>, vector<8x128xf32> -> vector<8x128xf32>
    %218 = arith.addf %211, %217 : vector<8x128xf32>
    %219 = arith.negf %218 : vector<8x128xf32>
    %220 = math.exp %219 : vector<8x128xf32>
    %cst_112 = arith.constant 1.000000e+00 : f32
    %221 = vector.broadcast %cst_112 : f32 to vector<8x128xf32>
    %222 = arith.addf %221, %220 : vector<8x128xf32>
    %223 = arith.divf %221, %222 : vector<8x128xf32>
    %224 = math.tanh %218 : vector<8x128xf32>
    %225 = vector.extract_strided_slice %223 {offsets = [0, 0], sizes = [8, 32], strides = [1, 1]} : vector<8x128xf32> to vector<8x32xf32>
    %226 = vector.extract_strided_slice %223 {offsets = [0, 32], sizes = [8, 32], strides = [1, 1]} : vector<8x128xf32> to vector<8x32xf32>
    %227 = vector.extract_strided_slice %224 {offsets = [0, 64], sizes = [8, 32], strides = [1, 1]} : vector<8x128xf32> to vector<8x32xf32>
    %228 = vector.extract_strided_slice %223 {offsets = [0, 96], sizes = [8, 32], strides = [1, 1]} : vector<8x128xf32> to vector<8x32xf32>
    %229 = arith.mulf %226, %215 : vector<8x32xf32>
    %230 = arith.mulf %225, %227 : vector<8x32xf32>
    %231 = arith.addf %229, %230 : vector<8x32xf32>
    %232 = math.tanh %231 : vector<8x32xf32>
    %233 = arith.mulf %228, %232 : vector<8x32xf32>
    %c0_113 = arith.constant 0 : index
    %c0_114 = arith.constant 0 : index
    %c0_115 = arith.constant 0 : index
    %234 = vector.load %arg9[%c0_113, %c0_114, %c0_115] : memref<2x8x32xf32, #tpu.memory_space<vmem>>, vector<1x8x32xf32>
    %235 = vector.shape_cast %234 : vector<1x8x32xf32> to vector<8x32xf32>
    %236 = vector.shape_cast %231 : vector<8x32xf32> to vector<1x8x32xf32>
    tpu.vector_store %arg9[%c0_113, %c0_114, %c0_115], %236 {strides = array<i32>} : memref<2x8x32xf32, #tpu.memory_space<vmem>>, vector<1x8x32xf32>,
    %c0_116 = arith.constant 0 : index
    %c0_117 = arith.constant 0 : index
    %c0_118 = arith.constant 0 : index
    %237 = vector.load %arg8[%c0_116, %c0_117, %c0_118] : memref<2x8x32xf32, #tpu.memory_space<vmem>>, vector<1x8x32xf32>
    %238 = vector.shape_cast %237 : vector<1x8x32xf32> to vector<8x32xf32>
    %239 = vector.shape_cast %233 : vector<8x32xf32> to vector<1x8x32xf32>
    tpu.vector_store %arg8[%c0_116, %c0_117, %c0_118], %239 {strides = array<i32>} : memref<2x8x32xf32, #tpu.memory_space<vmem>>, vector<1x8x32xf32>,
    %240 = arith.index_cast %209 : i32 to index
    %c0_119 = arith.constant 0 : index
    %241 = vector.load %arg6[%240, %c0_119] : memref<64x32xf32, #tpu.memory_space<vmem>>, vector<8x32xf32>
    tpu.vector_store %arg6[%240, %c0_119], %233 {strides = array<i32>} : memref<64x32xf32, #tpu.memory_space<vmem>>, vector<8x32xf32>,
    %c7_i32 = arith.constant 7 : i32
    %c8_i32_120 = arith.constant 8 : i32
    %242 = arith.muli %c7_i32, %c8_i32_120 : i32
    %243 = tpu.assume_multiple %242, 8 : i32
    %244 = arith.index_cast %243 : i32 to index
    %c0_121 = arith.constant 0 : index
    %245 = vector.load %arg1[%244, %c0_121] : memref<64x128xf32, #tpu.memory_space<vmem>>, vector<8x128xf32>
    %c0_122 = arith.constant 0 : index
    %c0_123 = arith.constant 0 : index
    %c0_124 = arith.constant 0 : index
    %246 = vector.load %arg8[%c0_122, %c0_123, %c0_124] : memref<2x8x32xf32, #tpu.memory_space<vmem>>, vector<1x8x32xf32>
    %247 = vector.shape_cast %246 : vector<1x8x32xf32> to vector<8x32xf32>
    %c0_125 = arith.constant 0 : index
    %c0_126 = arith.constant 0 : index
    %c0_127 = arith.constant 0 : index
    %248 = vector.load %arg9[%c0_125, %c0_126, %c0_127] : memref<2x8x32xf32, #tpu.memory_space<vmem>>, vector<1x8x32xf32>
    %249 = vector.shape_cast %248 : vector<1x8x32xf32> to vector<8x32xf32>
    %250 = arith.truncf %247 : vector<8x32xf32> to vector<8x32xbf16>
    %cst_128 = arith.constant dense<0.000000e+00> : vector<8x128xf32>
    %251 = tpu.matmul %250, %3, %cst_128 {dimension_numbers = #tpu.dot_dimension_numbers<[1], [0], [0], [1], [0, 0, 1, 1], [], []>} : vector<8x32xbf16>, vector<32x128xbf16>, vector<8x128xf32> -> vector<8x128xf32>
    %252 = arith.addf %245, %251 : vector<8x128xf32>
    %253 = arith.negf %252 : vector<8x128xf32>
    %254 = math.exp %253 : vector<8x128xf32>
    %cst_129 = arith.constant 1.000000e+00 : f32
    %255 = vector.broadcast %cst_129 : f32 to vector<8x128xf32>
    %256 = arith.addf %255, %254 : vector<8x128xf32>
    %257 = arith.divf %255, %256 : vector<8x128xf32>
    %258 = math.tanh %252 : vector<8x128xf32>
    %259 = vector.extract_strided_slice %257 {offsets = [0, 0], sizes = [8, 32], strides = [1, 1]} : vector<8x128xf32> to vector<8x32xf32>
    %260 = vector.extract_strided_slice %257 {offsets = [0, 32], sizes = [8, 32], strides = [1, 1]} : vector<8x128xf32> to vector<8x32xf32>
    %261 = vector.extract_strided_slice %258 {offsets = [0, 64], sizes = [8, 32], strides = [1, 1]} : vector<8x128xf32> to vector<8x32xf32>
    %262 = vector.extract_strided_slice %257 {offsets = [0, 96], sizes = [8, 32], strides = [1, 1]} : vector<8x128xf32> to vector<8x32xf32>
    %263 = arith.mulf %260, %249 : vector<8x32xf32>
    %264 = arith.mulf %259, %261 : vector<8x32xf32>
    %265 = arith.addf %263, %264 : vector<8x32xf32>
    %266 = math.tanh %265 : vector<8x32xf32>
    %267 = arith.mulf %262, %266 : vector<8x32xf32>
    %c0_130 = arith.constant 0 : index
    %c0_131 = arith.constant 0 : index
    %c0_132 = arith.constant 0 : index
    %268 = vector.load %arg9[%c0_130, %c0_131, %c0_132] : memref<2x8x32xf32, #tpu.memory_space<vmem>>, vector<1x8x32xf32>
    %269 = vector.shape_cast %268 : vector<1x8x32xf32> to vector<8x32xf32>
    %270 = vector.shape_cast %265 : vector<8x32xf32> to vector<1x8x32xf32>
    tpu.vector_store %arg9[%c0_130, %c0_131, %c0_132], %270 {strides = array<i32>} : memref<2x8x32xf32, #tpu.memory_space<vmem>>, vector<1x8x32xf32>,
    %c0_133 = arith.constant 0 : index
    %c0_134 = arith.constant 0 : index
    %c0_135 = arith.constant 0 : index
    %271 = vector.load %arg8[%c0_133, %c0_134, %c0_135] : memref<2x8x32xf32, #tpu.memory_space<vmem>>, vector<1x8x32xf32>
    %272 = vector.shape_cast %271 : vector<1x8x32xf32> to vector<8x32xf32>
    %273 = vector.shape_cast %267 : vector<8x32xf32> to vector<1x8x32xf32>
    tpu.vector_store %arg8[%c0_133, %c0_134, %c0_135], %273 {strides = array<i32>} : memref<2x8x32xf32, #tpu.memory_space<vmem>>, vector<1x8x32xf32>,
    %274 = arith.index_cast %243 : i32 to index
    %c0_136 = arith.constant 0 : index
    %275 = vector.load %arg6[%274, %c0_136] : memref<64x32xf32, #tpu.memory_space<vmem>>, vector<8x32xf32>
    tpu.vector_store %arg6[%274, %c0_136], %267 {strides = array<i32>} : memref<64x32xf32, #tpu.memory_space<vmem>>, vector<8x32xf32>,
    %c8_i32_137 = arith.constant 8 : i32
    %c0_138 = arith.constant 0 : index
    %c0_139 = arith.constant 0 : index
    %276 = vector.load %arg6[%c0_138, %c0_139] : memref<64x32xf32, #tpu.memory_space<vmem>>, vector<64x32xf32>
    %277 = arith.truncf %276 : vector<64x32xf32> to vector<64x32xbf16>
    %c0_140 = arith.constant 0 : index
    %c0_141 = arith.constant 0 : index
    %278 = vector.load %arg4[%c0_140, %c0_141] : memref<32x128xbf16, #tpu.memory_space<vmem>>, vector<32x128xbf16>
    %cst_142 = arith.constant dense<0.000000e+00> : vector<64x128xf32>
    %279 = tpu.matmul %277, %278, %cst_142 {dimension_numbers = #tpu.dot_dimension_numbers<[1], [0], [0], [1], [0, 0, 1, 1], [], []>} : vector<64x32xbf16>, vector<32x128xbf16>, vector<64x128xf32> -> vector<64x128xf32>
    %c0_143 = arith.constant 0 : index
    %c0_144 = arith.constant 0 : index
    %280 = vector.load %arg5[%c0_143, %c0_144] : memref<1x128xf32, #tpu.memory_space<vmem>>, vector<1x128xf32>
    %281 = vector.broadcast %280 : vector<1x128xf32> to vector<64x128xf32>
    %282 = arith.addf %279, %281 : vector<64x128xf32>
    %c0_145 = arith.constant 0 : index
    %c0_146 = arith.constant 0 : index
    %283 = vector.load %arg7[%c0_145, %c0_146] : memref<64x128xf32, #tpu.memory_space<vmem>>, vector<64x128xf32>
    tpu.vector_store %arg7[%c0_145, %c0_146], %282 {strides = array<i32>} : memref<64x128xf32, #tpu.memory_space<vmem>>, vector<64x128xf32>,
    %c0_147 = arith.constant 0 : index
    %c0_148 = arith.constant 0 : index
    %284 = vector.load %arg3[%c0_147, %c0_148] : memref<32x128xbf16, #tpu.memory_space<vmem>>, vector<32x128xbf16>
    %c0_i32_149 = arith.constant 0 : i32
    %c8_i32_150 = arith.constant 8 : i32
    %285 = arith.muli %c0_i32_149, %c8_i32_150 : i32
    %286 = tpu.assume_multiple %285, 8 : i32
    %287 = arith.index_cast %286 : i32 to index
    %c0_151 = arith.constant 0 : index
    %288 = vector.load %arg7[%287, %c0_151] : memref<64x128xf32, #tpu.memory_space<vmem>>, vector<8x128xf32>
    %c1 = arith.constant 1 : index
    %c0_152 = arith.constant 0 : index
    %c0_153 = arith.constant 0 : index
    %289 = vector.load %arg8[%c1, %c0_152, %c0_153] : memref<2x8x32xf32, #tpu.memory_space<vmem>>, vector<1x8x32xf32>
    %290 = vector.shape_cast %289 : vector<1x8x32xf32> to vector<8x32xf32>
    %c1_154 = arith.constant 1 : index
    %c0_155 = arith.constant 0 : index
    %c0_156 = arith.constant 0 : index
    %291 = vector.load %arg9[%c1_154, %c0_155, %c0_156] : memref<2x8x32xf32, #tpu.memory_space<vmem>>, vector<1x8x32xf32>
    %292 = vector.shape_cast %291 : vector<1x8x32xf32> to vector<8x32xf32>
    %293 = arith.truncf %290 : vector<8x32xf32> to vector<8x32xbf16>
    %cst_157 = arith.constant dense<0.000000e+00> : vector<8x128xf32>
    %294 = tpu.matmul %293, %284, %cst_157 {dimension_numbers = #tpu.dot_dimension_numbers<[1], [0], [0], [1], [0, 0, 1, 1], [], []>} : vector<8x32xbf16>, vector<32x128xbf16>, vector<8x128xf32> -> vector<8x128xf32>
    %295 = arith.addf %288, %294 : vector<8x128xf32>
    %296 = arith.negf %295 : vector<8x128xf32>
    %297 = math.exp %296 : vector<8x128xf32>
    %cst_158 = arith.constant 1.000000e+00 : f32
    %298 = vector.broadcast %cst_158 : f32 to vector<8x128xf32>
    %299 = arith.addf %298, %297 : vector<8x128xf32>
    %300 = arith.divf %298, %299 : vector<8x128xf32>
    %301 = math.tanh %295 : vector<8x128xf32>
    %302 = vector.extract_strided_slice %300 {offsets = [0, 0], sizes = [8, 32], strides = [1, 1]} : vector<8x128xf32> to vector<8x32xf32>
    %303 = vector.extract_strided_slice %300 {offsets = [0, 32], sizes = [8, 32], strides = [1, 1]} : vector<8x128xf32> to vector<8x32xf32>
    %304 = vector.extract_strided_slice %301 {offsets = [0, 64], sizes = [8, 32], strides = [1, 1]} : vector<8x128xf32> to vector<8x32xf32>
    %305 = vector.extract_strided_slice %300 {offsets = [0, 96], sizes = [8, 32], strides = [1, 1]} : vector<8x128xf32> to vector<8x32xf32>
    %306 = arith.mulf %303, %292 : vector<8x32xf32>
    %307 = arith.mulf %302, %304 : vector<8x32xf32>
    %308 = arith.addf %306, %307 : vector<8x32xf32>
    %309 = math.tanh %308 : vector<8x32xf32>
    %310 = arith.mulf %305, %309 : vector<8x32xf32>
    %c1_159 = arith.constant 1 : index
    %c0_160 = arith.constant 0 : index
    %c0_161 = arith.constant 0 : index
    %311 = vector.load %arg9[%c1_159, %c0_160, %c0_161] : memref<2x8x32xf32, #tpu.memory_space<vmem>>, vector<1x8x32xf32>
    %312 = vector.shape_cast %311 : vector<1x8x32xf32> to vector<8x32xf32>
    %313 = vector.shape_cast %308 : vector<8x32xf32> to vector<1x8x32xf32>
    tpu.vector_store %arg9[%c1_159, %c0_160, %c0_161], %313 {strides = array<i32>} : memref<2x8x32xf32, #tpu.memory_space<vmem>>, vector<1x8x32xf32>,
    %c1_162 = arith.constant 1 : index
    %c0_163 = arith.constant 0 : index
    %c0_164 = arith.constant 0 : index
    %314 = vector.load %arg8[%c1_162, %c0_163, %c0_164] : memref<2x8x32xf32, #tpu.memory_space<vmem>>, vector<1x8x32xf32>
    %315 = vector.shape_cast %314 : vector<1x8x32xf32> to vector<8x32xf32>
    %316 = vector.shape_cast %310 : vector<8x32xf32> to vector<1x8x32xf32>
    tpu.vector_store %arg8[%c1_162, %c0_163, %c0_164], %316 {strides = array<i32>} : memref<2x8x32xf32, #tpu.memory_space<vmem>>, vector<1x8x32xf32>,
    %317 = arith.index_cast %286 : i32 to index
    %c0_165 = arith.constant 0 : index
    %318 = vector.load %arg6[%317, %c0_165] : memref<64x32xf32, #tpu.memory_space<vmem>>, vector<8x32xf32>
    tpu.vector_store %arg6[%317, %c0_165], %310 {strides = array<i32>} : memref<64x32xf32, #tpu.memory_space<vmem>>, vector<8x32xf32>,
    %c1_i32_166 = arith.constant 1 : i32
    %c8_i32_167 = arith.constant 8 : i32
    %319 = arith.muli %c1_i32_166, %c8_i32_167 : i32
    %320 = tpu.assume_multiple %319, 8 : i32
    %321 = arith.index_cast %320 : i32 to index
    %c0_168 = arith.constant 0 : index
    %322 = vector.load %arg7[%321, %c0_168] : memref<64x128xf32, #tpu.memory_space<vmem>>, vector<8x128xf32>
    %c1_169 = arith.constant 1 : index
    %c0_170 = arith.constant 0 : index
    %c0_171 = arith.constant 0 : index
    %323 = vector.load %arg8[%c1_169, %c0_170, %c0_171] : memref<2x8x32xf32, #tpu.memory_space<vmem>>, vector<1x8x32xf32>
    %324 = vector.shape_cast %323 : vector<1x8x32xf32> to vector<8x32xf32>
    %c1_172 = arith.constant 1 : index
    %c0_173 = arith.constant 0 : index
    %c0_174 = arith.constant 0 : index
    %325 = vector.load %arg9[%c1_172, %c0_173, %c0_174] : memref<2x8x32xf32, #tpu.memory_space<vmem>>, vector<1x8x32xf32>
    %326 = vector.shape_cast %325 : vector<1x8x32xf32> to vector<8x32xf32>
    %327 = arith.truncf %324 : vector<8x32xf32> to vector<8x32xbf16>
    %cst_175 = arith.constant dense<0.000000e+00> : vector<8x128xf32>
    %328 = tpu.matmul %327, %284, %cst_175 {dimension_numbers = #tpu.dot_dimension_numbers<[1], [0], [0], [1], [0, 0, 1, 1], [], []>} : vector<8x32xbf16>, vector<32x128xbf16>, vector<8x128xf32> -> vector<8x128xf32>
    %329 = arith.addf %322, %328 : vector<8x128xf32>
    %330 = arith.negf %329 : vector<8x128xf32>
    %331 = math.exp %330 : vector<8x128xf32>
    %cst_176 = arith.constant 1.000000e+00 : f32
    %332 = vector.broadcast %cst_176 : f32 to vector<8x128xf32>
    %333 = arith.addf %332, %331 : vector<8x128xf32>
    %334 = arith.divf %332, %333 : vector<8x128xf32>
    %335 = math.tanh %329 : vector<8x128xf32>
    %336 = vector.extract_strided_slice %334 {offsets = [0, 0], sizes = [8, 32], strides = [1, 1]} : vector<8x128xf32> to vector<8x32xf32>
    %337 = vector.extract_strided_slice %334 {offsets = [0, 32], sizes = [8, 32], strides = [1, 1]} : vector<8x128xf32> to vector<8x32xf32>
    %338 = vector.extract_strided_slice %335 {offsets = [0, 64], sizes = [8, 32], strides = [1, 1]} : vector<8x128xf32> to vector<8x32xf32>
    %339 = vector.extract_strided_slice %334 {offsets = [0, 96], sizes = [8, 32], strides = [1, 1]} : vector<8x128xf32> to vector<8x32xf32>
    %340 = arith.mulf %337, %326 : vector<8x32xf32>
    %341 = arith.mulf %336, %338 : vector<8x32xf32>
    %342 = arith.addf %340, %341 : vector<8x32xf32>
    %343 = math.tanh %342 : vector<8x32xf32>
    %344 = arith.mulf %339, %343 : vector<8x32xf32>
    %c1_177 = arith.constant 1 : index
    %c0_178 = arith.constant 0 : index
    %c0_179 = arith.constant 0 : index
    %345 = vector.load %arg9[%c1_177, %c0_178, %c0_179] : memref<2x8x32xf32, #tpu.memory_space<vmem>>, vector<1x8x32xf32>
    %346 = vector.shape_cast %345 : vector<1x8x32xf32> to vector<8x32xf32>
    %347 = vector.shape_cast %342 : vector<8x32xf32> to vector<1x8x32xf32>
    tpu.vector_store %arg9[%c1_177, %c0_178, %c0_179], %347 {strides = array<i32>} : memref<2x8x32xf32, #tpu.memory_space<vmem>>, vector<1x8x32xf32>,
    %c1_180 = arith.constant 1 : index
    %c0_181 = arith.constant 0 : index
    %c0_182 = arith.constant 0 : index
    %348 = vector.load %arg8[%c1_180, %c0_181, %c0_182] : memref<2x8x32xf32, #tpu.memory_space<vmem>>, vector<1x8x32xf32>
    %349 = vector.shape_cast %348 : vector<1x8x32xf32> to vector<8x32xf32>
    %350 = vector.shape_cast %344 : vector<8x32xf32> to vector<1x8x32xf32>
    tpu.vector_store %arg8[%c1_180, %c0_181, %c0_182], %350 {strides = array<i32>} : memref<2x8x32xf32, #tpu.memory_space<vmem>>, vector<1x8x32xf32>,
    %351 = arith.index_cast %320 : i32 to index
    %c0_183 = arith.constant 0 : index
    %352 = vector.load %arg6[%351, %c0_183] : memref<64x32xf32, #tpu.memory_space<vmem>>, vector<8x32xf32>
    tpu.vector_store %arg6[%351, %c0_183], %344 {strides = array<i32>} : memref<64x32xf32, #tpu.memory_space<vmem>>, vector<8x32xf32>,
    %c2_i32_184 = arith.constant 2 : i32
    %c8_i32_185 = arith.constant 8 : i32
    %353 = arith.muli %c2_i32_184, %c8_i32_185 : i32
    %354 = tpu.assume_multiple %353, 8 : i32
    %355 = arith.index_cast %354 : i32 to index
    %c0_186 = arith.constant 0 : index
    %356 = vector.load %arg7[%355, %c0_186] : memref<64x128xf32, #tpu.memory_space<vmem>>, vector<8x128xf32>
    %c1_187 = arith.constant 1 : index
    %c0_188 = arith.constant 0 : index
    %c0_189 = arith.constant 0 : index
    %357 = vector.load %arg8[%c1_187, %c0_188, %c0_189] : memref<2x8x32xf32, #tpu.memory_space<vmem>>, vector<1x8x32xf32>
    %358 = vector.shape_cast %357 : vector<1x8x32xf32> to vector<8x32xf32>
    %c1_190 = arith.constant 1 : index
    %c0_191 = arith.constant 0 : index
    %c0_192 = arith.constant 0 : index
    %359 = vector.load %arg9[%c1_190, %c0_191, %c0_192] : memref<2x8x32xf32, #tpu.memory_space<vmem>>, vector<1x8x32xf32>
    %360 = vector.shape_cast %359 : vector<1x8x32xf32> to vector<8x32xf32>
    %361 = arith.truncf %358 : vector<8x32xf32> to vector<8x32xbf16>
    %cst_193 = arith.constant dense<0.000000e+00> : vector<8x128xf32>
    %362 = tpu.matmul %361, %284, %cst_193 {dimension_numbers = #tpu.dot_dimension_numbers<[1], [0], [0], [1], [0, 0, 1, 1], [], []>} : vector<8x32xbf16>, vector<32x128xbf16>, vector<8x128xf32> -> vector<8x128xf32>
    %363 = arith.addf %356, %362 : vector<8x128xf32>
    %364 = arith.negf %363 : vector<8x128xf32>
    %365 = math.exp %364 : vector<8x128xf32>
    %cst_194 = arith.constant 1.000000e+00 : f32
    %366 = vector.broadcast %cst_194 : f32 to vector<8x128xf32>
    %367 = arith.addf %366, %365 : vector<8x128xf32>
    %368 = arith.divf %366, %367 : vector<8x128xf32>
    %369 = math.tanh %363 : vector<8x128xf32>
    %370 = vector.extract_strided_slice %368 {offsets = [0, 0], sizes = [8, 32], strides = [1, 1]} : vector<8x128xf32> to vector<8x32xf32>
    %371 = vector.extract_strided_slice %368 {offsets = [0, 32], sizes = [8, 32], strides = [1, 1]} : vector<8x128xf32> to vector<8x32xf32>
    %372 = vector.extract_strided_slice %369 {offsets = [0, 64], sizes = [8, 32], strides = [1, 1]} : vector<8x128xf32> to vector<8x32xf32>
    %373 = vector.extract_strided_slice %368 {offsets = [0, 96], sizes = [8, 32], strides = [1, 1]} : vector<8x128xf32> to vector<8x32xf32>
    %374 = arith.mulf %371, %360 : vector<8x32xf32>
    %375 = arith.mulf %370, %372 : vector<8x32xf32>
    %376 = arith.addf %374, %375 : vector<8x32xf32>
    %377 = math.tanh %376 : vector<8x32xf32>
    %378 = arith.mulf %373, %377 : vector<8x32xf32>
    %c1_195 = arith.constant 1 : index
    %c0_196 = arith.constant 0 : index
    %c0_197 = arith.constant 0 : index
    %379 = vector.load %arg9[%c1_195, %c0_196, %c0_197] : memref<2x8x32xf32, #tpu.memory_space<vmem>>, vector<1x8x32xf32>
    %380 = vector.shape_cast %379 : vector<1x8x32xf32> to vector<8x32xf32>
    %381 = vector.shape_cast %376 : vector<8x32xf32> to vector<1x8x32xf32>
    tpu.vector_store %arg9[%c1_195, %c0_196, %c0_197], %381 {strides = array<i32>} : memref<2x8x32xf32, #tpu.memory_space<vmem>>, vector<1x8x32xf32>,
    %c1_198 = arith.constant 1 : index
    %c0_199 = arith.constant 0 : index
    %c0_200 = arith.constant 0 : index
    %382 = vector.load %arg8[%c1_198, %c0_199, %c0_200] : memref<2x8x32xf32, #tpu.memory_space<vmem>>, vector<1x8x32xf32>
    %383 = vector.shape_cast %382 : vector<1x8x32xf32> to vector<8x32xf32>
    %384 = vector.shape_cast %378 : vector<8x32xf32> to vector<1x8x32xf32>
    tpu.vector_store %arg8[%c1_198, %c0_199, %c0_200], %384 {strides = array<i32>} : memref<2x8x32xf32, #tpu.memory_space<vmem>>, vector<1x8x32xf32>,
    %385 = arith.index_cast %354 : i32 to index
    %c0_201 = arith.constant 0 : index
    %386 = vector.load %arg6[%385, %c0_201] : memref<64x32xf32, #tpu.memory_space<vmem>>, vector<8x32xf32>
    tpu.vector_store %arg6[%385, %c0_201], %378 {strides = array<i32>} : memref<64x32xf32, #tpu.memory_space<vmem>>, vector<8x32xf32>,
    %c3_i32_202 = arith.constant 3 : i32
    %c8_i32_203 = arith.constant 8 : i32
    %387 = arith.muli %c3_i32_202, %c8_i32_203 : i32
    %388 = tpu.assume_multiple %387, 8 : i32
    %389 = arith.index_cast %388 : i32 to index
    %c0_204 = arith.constant 0 : index
    %390 = vector.load %arg7[%389, %c0_204] : memref<64x128xf32, #tpu.memory_space<vmem>>, vector<8x128xf32>
    %c1_205 = arith.constant 1 : index
    %c0_206 = arith.constant 0 : index
    %c0_207 = arith.constant 0 : index
    %391 = vector.load %arg8[%c1_205, %c0_206, %c0_207] : memref<2x8x32xf32, #tpu.memory_space<vmem>>, vector<1x8x32xf32>
    %392 = vector.shape_cast %391 : vector<1x8x32xf32> to vector<8x32xf32>
    %c1_208 = arith.constant 1 : index
    %c0_209 = arith.constant 0 : index
    %c0_210 = arith.constant 0 : index
    %393 = vector.load %arg9[%c1_208, %c0_209, %c0_210] : memref<2x8x32xf32, #tpu.memory_space<vmem>>, vector<1x8x32xf32>
    %394 = vector.shape_cast %393 : vector<1x8x32xf32> to vector<8x32xf32>
    %395 = arith.truncf %392 : vector<8x32xf32> to vector<8x32xbf16>
    %cst_211 = arith.constant dense<0.000000e+00> : vector<8x128xf32>
    %396 = tpu.matmul %395, %284, %cst_211 {dimension_numbers = #tpu.dot_dimension_numbers<[1], [0], [0], [1], [0, 0, 1, 1], [], []>} : vector<8x32xbf16>, vector<32x128xbf16>, vector<8x128xf32> -> vector<8x128xf32>
    %397 = arith.addf %390, %396 : vector<8x128xf32>
    %398 = arith.negf %397 : vector<8x128xf32>
    %399 = math.exp %398 : vector<8x128xf32>
    %cst_212 = arith.constant 1.000000e+00 : f32
    %400 = vector.broadcast %cst_212 : f32 to vector<8x128xf32>
    %401 = arith.addf %400, %399 : vector<8x128xf32>
    %402 = arith.divf %400, %401 : vector<8x128xf32>
    %403 = math.tanh %397 : vector<8x128xf32>
    %404 = vector.extract_strided_slice %402 {offsets = [0, 0], sizes = [8, 32], strides = [1, 1]} : vector<8x128xf32> to vector<8x32xf32>
    %405 = vector.extract_strided_slice %402 {offsets = [0, 32], sizes = [8, 32], strides = [1, 1]} : vector<8x128xf32> to vector<8x32xf32>
    %406 = vector.extract_strided_slice %403 {offsets = [0, 64], sizes = [8, 32], strides = [1, 1]} : vector<8x128xf32> to vector<8x32xf32>
    %407 = vector.extract_strided_slice %402 {offsets = [0, 96], sizes = [8, 32], strides = [1, 1]} : vector<8x128xf32> to vector<8x32xf32>
    %408 = arith.mulf %405, %394 : vector<8x32xf32>
    %409 = arith.mulf %404, %406 : vector<8x32xf32>
    %410 = arith.addf %408, %409 : vector<8x32xf32>
    %411 = math.tanh %410 : vector<8x32xf32>
    %412 = arith.mulf %407, %411 : vector<8x32xf32>
    %c1_213 = arith.constant 1 : index
    %c0_214 = arith.constant 0 : index
    %c0_215 = arith.constant 0 : index
    %413 = vector.load %arg9[%c1_213, %c0_214, %c0_215] : memref<2x8x32xf32, #tpu.memory_space<vmem>>, vector<1x8x32xf32>
    %414 = vector.shape_cast %413 : vector<1x8x32xf32> to vector<8x32xf32>
    %415 = vector.shape_cast %410 : vector<8x32xf32> to vector<1x8x32xf32>
    tpu.vector_store %arg9[%c1_213, %c0_214, %c0_215], %415 {strides = array<i32>} : memref<2x8x32xf32, #tpu.memory_space<vmem>>, vector<1x8x32xf32>,
    %c1_216 = arith.constant 1 : index
    %c0_217 = arith.constant 0 : index
    %c0_218 = arith.constant 0 : index
    %416 = vector.load %arg8[%c1_216, %c0_217, %c0_218] : memref<2x8x32xf32, #tpu.memory_space<vmem>>, vector<1x8x32xf32>
    %417 = vector.shape_cast %416 : vector<1x8x32xf32> to vector<8x32xf32>
    %418 = vector.shape_cast %412 : vector<8x32xf32> to vector<1x8x32xf32>
    tpu.vector_store %arg8[%c1_216, %c0_217, %c0_218], %418 {strides = array<i32>} : memref<2x8x32xf32, #tpu.memory_space<vmem>>, vector<1x8x32xf32>,
    %419 = arith.index_cast %388 : i32 to index
    %c0_219 = arith.constant 0 : index
    %420 = vector.load %arg6[%419, %c0_219] : memref<64x32xf32, #tpu.memory_space<vmem>>, vector<8x32xf32>
    tpu.vector_store %arg6[%419, %c0_219], %412 {strides = array<i32>} : memref<64x32xf32, #tpu.memory_space<vmem>>, vector<8x32xf32>,
    %c4_i32_220 = arith.constant 4 : i32
    %c8_i32_221 = arith.constant 8 : i32
    %421 = arith.muli %c4_i32_220, %c8_i32_221 : i32
    %422 = tpu.assume_multiple %421, 8 : i32
    %423 = arith.index_cast %422 : i32 to index
    %c0_222 = arith.constant 0 : index
    %424 = vector.load %arg7[%423, %c0_222] : memref<64x128xf32, #tpu.memory_space<vmem>>, vector<8x128xf32>
    %c1_223 = arith.constant 1 : index
    %c0_224 = arith.constant 0 : index
    %c0_225 = arith.constant 0 : index
    %425 = vector.load %arg8[%c1_223, %c0_224, %c0_225] : memref<2x8x32xf32, #tpu.memory_space<vmem>>, vector<1x8x32xf32>
    %426 = vector.shape_cast %425 : vector<1x8x32xf32> to vector<8x32xf32>
    %c1_226 = arith.constant 1 : index
    %c0_227 = arith.constant 0 : index
    %c0_228 = arith.constant 0 : index
    %427 = vector.load %arg9[%c1_226, %c0_227, %c0_228] : memref<2x8x32xf32, #tpu.memory_space<vmem>>, vector<1x8x32xf32>
    %428 = vector.shape_cast %427 : vector<1x8x32xf32> to vector<8x32xf32>
    %429 = arith.truncf %426 : vector<8x32xf32> to vector<8x32xbf16>
    %cst_229 = arith.constant dense<0.000000e+00> : vector<8x128xf32>
    %430 = tpu.matmul %429, %284, %cst_229 {dimension_numbers = #tpu.dot_dimension_numbers<[1], [0], [0], [1], [0, 0, 1, 1], [], []>} : vector<8x32xbf16>, vector<32x128xbf16>, vector<8x128xf32> -> vector<8x128xf32>
    %431 = arith.addf %424, %430 : vector<8x128xf32>
    %432 = arith.negf %431 : vector<8x128xf32>
    %433 = math.exp %432 : vector<8x128xf32>
    %cst_230 = arith.constant 1.000000e+00 : f32
    %434 = vector.broadcast %cst_230 : f32 to vector<8x128xf32>
    %435 = arith.addf %434, %433 : vector<8x128xf32>
    %436 = arith.divf %434, %435 : vector<8x128xf32>
    %437 = math.tanh %431 : vector<8x128xf32>
    %438 = vector.extract_strided_slice %436 {offsets = [0, 0], sizes = [8, 32], strides = [1, 1]} : vector<8x128xf32> to vector<8x32xf32>
    %439 = vector.extract_strided_slice %436 {offsets = [0, 32], sizes = [8, 32], strides = [1, 1]} : vector<8x128xf32> to vector<8x32xf32>
    %440 = vector.extract_strided_slice %437 {offsets = [0, 64], sizes = [8, 32], strides = [1, 1]} : vector<8x128xf32> to vector<8x32xf32>
    %441 = vector.extract_strided_slice %436 {offsets = [0, 96], sizes = [8, 32], strides = [1, 1]} : vector<8x128xf32> to vector<8x32xf32>
    %442 = arith.mulf %439, %428 : vector<8x32xf32>
    %443 = arith.mulf %438, %440 : vector<8x32xf32>
    %444 = arith.addf %442, %443 : vector<8x32xf32>
    %445 = math.tanh %444 : vector<8x32xf32>
    %446 = arith.mulf %441, %445 : vector<8x32xf32>
    %c1_231 = arith.constant 1 : index
    %c0_232 = arith.constant 0 : index
    %c0_233 = arith.constant 0 : index
    %447 = vector.load %arg9[%c1_231, %c0_232, %c0_233] : memref<2x8x32xf32, #tpu.memory_space<vmem>>, vector<1x8x32xf32>
    %448 = vector.shape_cast %447 : vector<1x8x32xf32> to vector<8x32xf32>
    %449 = vector.shape_cast %444 : vector<8x32xf32> to vector<1x8x32xf32>
    tpu.vector_store %arg9[%c1_231, %c0_232, %c0_233], %449 {strides = array<i32>} : memref<2x8x32xf32, #tpu.memory_space<vmem>>, vector<1x8x32xf32>,
    %c1_234 = arith.constant 1 : index
    %c0_235 = arith.constant 0 : index
    %c0_236 = arith.constant 0 : index
    %450 = vector.load %arg8[%c1_234, %c0_235, %c0_236] : memref<2x8x32xf32, #tpu.memory_space<vmem>>, vector<1x8x32xf32>
    %451 = vector.shape_cast %450 : vector<1x8x32xf32> to vector<8x32xf32>
    %452 = vector.shape_cast %446 : vector<8x32xf32> to vector<1x8x32xf32>
    tpu.vector_store %arg8[%c1_234, %c0_235, %c0_236], %452 {strides = array<i32>} : memref<2x8x32xf32, #tpu.memory_space<vmem>>, vector<1x8x32xf32>,
    %453 = arith.index_cast %422 : i32 to index
    %c0_237 = arith.constant 0 : index
    %454 = vector.load %arg6[%453, %c0_237] : memref<64x32xf32, #tpu.memory_space<vmem>>, vector<8x32xf32>
    tpu.vector_store %arg6[%453, %c0_237], %446 {strides = array<i32>} : memref<64x32xf32, #tpu.memory_space<vmem>>, vector<8x32xf32>,
    %c5_i32_238 = arith.constant 5 : i32
    %c8_i32_239 = arith.constant 8 : i32
    %455 = arith.muli %c5_i32_238, %c8_i32_239 : i32
    %456 = tpu.assume_multiple %455, 8 : i32
    %457 = arith.index_cast %456 : i32 to index
    %c0_240 = arith.constant 0 : index
    %458 = vector.load %arg7[%457, %c0_240] : memref<64x128xf32, #tpu.memory_space<vmem>>, vector<8x128xf32>
    %c1_241 = arith.constant 1 : index
    %c0_242 = arith.constant 0 : index
    %c0_243 = arith.constant 0 : index
    %459 = vector.load %arg8[%c1_241, %c0_242, %c0_243] : memref<2x8x32xf32, #tpu.memory_space<vmem>>, vector<1x8x32xf32>
    %460 = vector.shape_cast %459 : vector<1x8x32xf32> to vector<8x32xf32>
    %c1_244 = arith.constant 1 : index
    %c0_245 = arith.constant 0 : index
    %c0_246 = arith.constant 0 : index
    %461 = vector.load %arg9[%c1_244, %c0_245, %c0_246] : memref<2x8x32xf32, #tpu.memory_space<vmem>>, vector<1x8x32xf32>
    %462 = vector.shape_cast %461 : vector<1x8x32xf32> to vector<8x32xf32>
    %463 = arith.truncf %460 : vector<8x32xf32> to vector<8x32xbf16>
    %cst_247 = arith.constant dense<0.000000e+00> : vector<8x128xf32>
    %464 = tpu.matmul %463, %284, %cst_247 {dimension_numbers = #tpu.dot_dimension_numbers<[1], [0], [0], [1], [0, 0, 1, 1], [], []>} : vector<8x32xbf16>, vector<32x128xbf16>, vector<8x128xf32> -> vector<8x128xf32>
    %465 = arith.addf %458, %464 : vector<8x128xf32>
    %466 = arith.negf %465 : vector<8x128xf32>
    %467 = math.exp %466 : vector<8x128xf32>
    %cst_248 = arith.constant 1.000000e+00 : f32
    %468 = vector.broadcast %cst_248 : f32 to vector<8x128xf32>
    %469 = arith.addf %468, %467 : vector<8x128xf32>
    %470 = arith.divf %468, %469 : vector<8x128xf32>
    %471 = math.tanh %465 : vector<8x128xf32>
    %472 = vector.extract_strided_slice %470 {offsets = [0, 0], sizes = [8, 32], strides = [1, 1]} : vector<8x128xf32> to vector<8x32xf32>
    %473 = vector.extract_strided_slice %470 {offsets = [0, 32], sizes = [8, 32], strides = [1, 1]} : vector<8x128xf32> to vector<8x32xf32>
    %474 = vector.extract_strided_slice %471 {offsets = [0, 64], sizes = [8, 32], strides = [1, 1]} : vector<8x128xf32> to vector<8x32xf32>
    %475 = vector.extract_strided_slice %470 {offsets = [0, 96], sizes = [8, 32], strides = [1, 1]} : vector<8x128xf32> to vector<8x32xf32>
    %476 = arith.mulf %473, %462 : vector<8x32xf32>
    %477 = arith.mulf %472, %474 : vector<8x32xf32>
    %478 = arith.addf %476, %477 : vector<8x32xf32>
    %479 = math.tanh %478 : vector<8x32xf32>
    %480 = arith.mulf %475, %479 : vector<8x32xf32>
    %c1_249 = arith.constant 1 : index
    %c0_250 = arith.constant 0 : index
    %c0_251 = arith.constant 0 : index
    %481 = vector.load %arg9[%c1_249, %c0_250, %c0_251] : memref<2x8x32xf32, #tpu.memory_space<vmem>>, vector<1x8x32xf32>
    %482 = vector.shape_cast %481 : vector<1x8x32xf32> to vector<8x32xf32>
    %483 = vector.shape_cast %478 : vector<8x32xf32> to vector<1x8x32xf32>
    tpu.vector_store %arg9[%c1_249, %c0_250, %c0_251], %483 {strides = array<i32>} : memref<2x8x32xf32, #tpu.memory_space<vmem>>, vector<1x8x32xf32>,
    %c1_252 = arith.constant 1 : index
    %c0_253 = arith.constant 0 : index
    %c0_254 = arith.constant 0 : index
    %484 = vector.load %arg8[%c1_252, %c0_253, %c0_254] : memref<2x8x32xf32, #tpu.memory_space<vmem>>, vector<1x8x32xf32>
    %485 = vector.shape_cast %484 : vector<1x8x32xf32> to vector<8x32xf32>
    %486 = vector.shape_cast %480 : vector<8x32xf32> to vector<1x8x32xf32>
    tpu.vector_store %arg8[%c1_252, %c0_253, %c0_254], %486 {strides = array<i32>} : memref<2x8x32xf32, #tpu.memory_space<vmem>>, vector<1x8x32xf32>,
    %487 = arith.index_cast %456 : i32 to index
    %c0_255 = arith.constant 0 : index
    %488 = vector.load %arg6[%487, %c0_255] : memref<64x32xf32, #tpu.memory_space<vmem>>, vector<8x32xf32>
    tpu.vector_store %arg6[%487, %c0_255], %480 {strides = array<i32>} : memref<64x32xf32, #tpu.memory_space<vmem>>, vector<8x32xf32>,
    %c6_i32_256 = arith.constant 6 : i32
    %c8_i32_257 = arith.constant 8 : i32
    %489 = arith.muli %c6_i32_256, %c8_i32_257 : i32
    %490 = tpu.assume_multiple %489, 8 : i32
    %491 = arith.index_cast %490 : i32 to index
    %c0_258 = arith.constant 0 : index
    %492 = vector.load %arg7[%491, %c0_258] : memref<64x128xf32, #tpu.memory_space<vmem>>, vector<8x128xf32>
    %c1_259 = arith.constant 1 : index
    %c0_260 = arith.constant 0 : index
    %c0_261 = arith.constant 0 : index
    %493 = vector.load %arg8[%c1_259, %c0_260, %c0_261] : memref<2x8x32xf32, #tpu.memory_space<vmem>>, vector<1x8x32xf32>
    %494 = vector.shape_cast %493 : vector<1x8x32xf32> to vector<8x32xf32>
    %c1_262 = arith.constant 1 : index
    %c0_263 = arith.constant 0 : index
    %c0_264 = arith.constant 0 : index
    %495 = vector.load %arg9[%c1_262, %c0_263, %c0_264] : memref<2x8x32xf32, #tpu.memory_space<vmem>>, vector<1x8x32xf32>
    %496 = vector.shape_cast %495 : vector<1x8x32xf32> to vector<8x32xf32>
    %497 = arith.truncf %494 : vector<8x32xf32> to vector<8x32xbf16>
    %cst_265 = arith.constant dense<0.000000e+00> : vector<8x128xf32>
    %498 = tpu.matmul %497, %284, %cst_265 {dimension_numbers = #tpu.dot_dimension_numbers<[1], [0], [0], [1], [0, 0, 1, 1], [], []>} : vector<8x32xbf16>, vector<32x128xbf16>, vector<8x128xf32> -> vector<8x128xf32>
    %499 = arith.addf %492, %498 : vector<8x128xf32>
    %500 = arith.negf %499 : vector<8x128xf32>
    %501 = math.exp %500 : vector<8x128xf32>
    %cst_266 = arith.constant 1.000000e+00 : f32
    %502 = vector.broadcast %cst_266 : f32 to vector<8x128xf32>
    %503 = arith.addf %502, %501 : vector<8x128xf32>
    %504 = arith.divf %502, %503 : vector<8x128xf32>
    %505 = math.tanh %499 : vector<8x128xf32>
    %506 = vector.extract_strided_slice %504 {offsets = [0, 0], sizes = [8, 32], strides = [1, 1]} : vector<8x128xf32> to vector<8x32xf32>
    %507 = vector.extract_strided_slice %504 {offsets = [0, 32], sizes = [8, 32], strides = [1, 1]} : vector<8x128xf32> to vector<8x32xf32>
    %508 = vector.extract_strided_slice %505 {offsets = [0, 64], sizes = [8, 32], strides = [1, 1]} : vector<8x128xf32> to vector<8x32xf32>
    %509 = vector.extract_strided_slice %504 {offsets = [0, 96], sizes = [8, 32], strides = [1, 1]} : vector<8x128xf32> to vector<8x32xf32>
    %510 = arith.mulf %507, %496 : vector<8x32xf32>
    %511 = arith.mulf %506, %508 : vector<8x32xf32>
    %512 = arith.addf %510, %511 : vector<8x32xf32>
    %513 = math.tanh %512 : vector<8x32xf32>
    %514 = arith.mulf %509, %513 : vector<8x32xf32>
    %c1_267 = arith.constant 1 : index
    %c0_268 = arith.constant 0 : index
    %c0_269 = arith.constant 0 : index
    %515 = vector.load %arg9[%c1_267, %c0_268, %c0_269] : memref<2x8x32xf32, #tpu.memory_space<vmem>>, vector<1x8x32xf32>
    %516 = vector.shape_cast %515 : vector<1x8x32xf32> to vector<8x32xf32>
    %517 = vector.shape_cast %512 : vector<8x32xf32> to vector<1x8x32xf32>
    tpu.vector_store %arg9[%c1_267, %c0_268, %c0_269], %517 {strides = array<i32>} : memref<2x8x32xf32, #tpu.memory_space<vmem>>, vector<1x8x32xf32>,
    %c1_270 = arith.constant 1 : index
    %c0_271 = arith.constant 0 : index
    %c0_272 = arith.constant 0 : index
    %518 = vector.load %arg8[%c1_270, %c0_271, %c0_272] : memref<2x8x32xf32, #tpu.memory_space<vmem>>, vector<1x8x32xf32>
    %519 = vector.shape_cast %518 : vector<1x8x32xf32> to vector<8x32xf32>
    %520 = vector.shape_cast %514 : vector<8x32xf32> to vector<1x8x32xf32>
    tpu.vector_store %arg8[%c1_270, %c0_271, %c0_272], %520 {strides = array<i32>} : memref<2x8x32xf32, #tpu.memory_space<vmem>>, vector<1x8x32xf32>,
    %521 = arith.index_cast %490 : i32 to index
    %c0_273 = arith.constant 0 : index
    %522 = vector.load %arg6[%521, %c0_273] : memref<64x32xf32, #tpu.memory_space<vmem>>, vector<8x32xf32>
    tpu.vector_store %arg6[%521, %c0_273], %514 {strides = array<i32>} : memref<64x32xf32, #tpu.memory_space<vmem>>, vector<8x32xf32>,
    %c7_i32_274 = arith.constant 7 : i32
    %c8_i32_275 = arith.constant 8 : i32
    %523 = arith.muli %c7_i32_274, %c8_i32_275 : i32
    %524 = tpu.assume_multiple %523, 8 : i32
    %525 = arith.index_cast %524 : i32 to index
    %c0_276 = arith.constant 0 : index
    %526 = vector.load %arg7[%525, %c0_276] : memref<64x128xf32, #tpu.memory_space<vmem>>, vector<8x128xf32>
    %c1_277 = arith.constant 1 : index
    %c0_278 = arith.constant 0 : index
    %c0_279 = arith.constant 0 : index
    %527 = vector.load %arg8[%c1_277, %c0_278, %c0_279] : memref<2x8x32xf32, #tpu.memory_space<vmem>>, vector<1x8x32xf32>
    %528 = vector.shape_cast %527 : vector<1x8x32xf32> to vector<8x32xf32>
    %c1_280 = arith.constant 1 : index
    %c0_281 = arith.constant 0 : index
    %c0_282 = arith.constant 0 : index
    %529 = vector.load %arg9[%c1_280, %c0_281, %c0_282] : memref<2x8x32xf32, #tpu.memory_space<vmem>>, vector<1x8x32xf32>
    %530 = vector.shape_cast %529 : vector<1x8x32xf32> to vector<8x32xf32>
    %531 = arith.truncf %528 : vector<8x32xf32> to vector<8x32xbf16>
    %cst_283 = arith.constant dense<0.000000e+00> : vector<8x128xf32>
    %532 = tpu.matmul %531, %284, %cst_283 {dimension_numbers = #tpu.dot_dimension_numbers<[1], [0], [0], [1], [0, 0, 1, 1], [], []>} : vector<8x32xbf16>, vector<32x128xbf16>, vector<8x128xf32> -> vector<8x128xf32>
    %533 = arith.addf %526, %532 : vector<8x128xf32>
    %534 = arith.negf %533 : vector<8x128xf32>
    %535 = math.exp %534 : vector<8x128xf32>
    %cst_284 = arith.constant 1.000000e+00 : f32
    %536 = vector.broadcast %cst_284 : f32 to vector<8x128xf32>
    %537 = arith.addf %536, %535 : vector<8x128xf32>
    %538 = arith.divf %536, %537 : vector<8x128xf32>
    %539 = math.tanh %533 : vector<8x128xf32>
    %540 = vector.extract_strided_slice %538 {offsets = [0, 0], sizes = [8, 32], strides = [1, 1]} : vector<8x128xf32> to vector<8x32xf32>
    %541 = vector.extract_strided_slice %538 {offsets = [0, 32], sizes = [8, 32], strides = [1, 1]} : vector<8x128xf32> to vector<8x32xf32>
    %542 = vector.extract_strided_slice %539 {offsets = [0, 64], sizes = [8, 32], strides = [1, 1]} : vector<8x128xf32> to vector<8x32xf32>
    %543 = vector.extract_strided_slice %538 {offsets = [0, 96], sizes = [8, 32], strides = [1, 1]} : vector<8x128xf32> to vector<8x32xf32>
    %544 = arith.mulf %541, %530 : vector<8x32xf32>
    %545 = arith.mulf %540, %542 : vector<8x32xf32>
    %546 = arith.addf %544, %545 : vector<8x32xf32>
    %547 = math.tanh %546 : vector<8x32xf32>
    %548 = arith.mulf %543, %547 : vector<8x32xf32>
    %c1_285 = arith.constant 1 : index
    %c0_286 = arith.constant 0 : index
    %c0_287 = arith.constant 0 : index
    %549 = vector.load %arg9[%c1_285, %c0_286, %c0_287] : memref<2x8x32xf32, #tpu.memory_space<vmem>>, vector<1x8x32xf32>
    %550 = vector.shape_cast %549 : vector<1x8x32xf32> to vector<8x32xf32>
    %551 = vector.shape_cast %546 : vector<8x32xf32> to vector<1x8x32xf32>
    tpu.vector_store %arg9[%c1_285, %c0_286, %c0_287], %551 {strides = array<i32>} : memref<2x8x32xf32, #tpu.memory_space<vmem>>, vector<1x8x32xf32>,
    %c1_288 = arith.constant 1 : index
    %c0_289 = arith.constant 0 : index
    %c0_290 = arith.constant 0 : index
    %552 = vector.load %arg8[%c1_288, %c0_289, %c0_290] : memref<2x8x32xf32, #tpu.memory_space<vmem>>, vector<1x8x32xf32>
    %553 = vector.shape_cast %552 : vector<1x8x32xf32> to vector<8x32xf32>
    %554 = vector.shape_cast %548 : vector<8x32xf32> to vector<1x8x32xf32>
    tpu.vector_store %arg8[%c1_288, %c0_289, %c0_290], %554 {strides = array<i32>} : memref<2x8x32xf32, #tpu.memory_space<vmem>>, vector<1x8x32xf32>,
    %555 = arith.index_cast %524 : i32 to index
    %c0_291 = arith.constant 0 : index
    %556 = vector.load %arg6[%555, %c0_291] : memref<64x32xf32, #tpu.memory_space<vmem>>, vector<8x32xf32>
    tpu.vector_store %arg6[%555, %c0_291], %548 {strides = array<i32>} : memref<64x32xf32, #tpu.memory_space<vmem>>, vector<8x32xf32>,
    %c8_i32_292 = arith.constant 8 : i32
    return
  }
  func.func @transform_0(%arg0: i32) -> (i32, i32) {
    %c0_i32 = arith.constant 0 : i32
    %c0_i32_0 = arith.constant 0 : i32
    return %arg0, %c0_i32 : i32, i32
  }
  func.func @transform_1(%arg0: i32) -> (i32, i32) {
    %c0_i32 = arith.constant 0 : i32
    %c0_i32_0 = arith.constant 0 : i32
    %c0_i32_1 = arith.constant 0 : i32
    return %c0_i32, %c0_i32_0 : i32, i32
  }
  func.func @transform_2(%arg0: i32) -> (i32, i32) {
    %c0_i32 = arith.constant 0 : i32
    %c0_i32_0 = arith.constant 0 : i32
    %c0_i32_1 = arith.constant 0 : i32
    return %c0_i32, %c0_i32_0 : i32, i32
  }
  func.func @transform_3(%arg0: i32) -> (i32, i32) {
    %c0_i32 = arith.constant 0 : i32
    %c0_i32_0 = arith.constant 0 : i32
    %c0_i32_1 = arith.constant 0 : i32
    return %c0_i32, %c0_i32_0 : i32, i32
  }
  func.func @transform_4(%arg0: i32) -> (i32, i32) {
    %c0_i32 = arith.constant 0 : i32
    %c0_i32_0 = arith.constant 0 : i32
    %c0_i32_1 = arith.constant 0 : i32
    return %c0_i32, %c0_i32_0 : i32, i32
  }
  func.func @transform_5(%arg0: i32) -> (i32, i32) {
    %c0_i32 = arith.constant 0 : i32
    %c0_i32_0 = arith.constant 0 : i32
    return %arg0, %c0_i32 : i32, i32
  }
}

</mosaic_0001>

<bundles_post_ra>
// kernel: lstm_forward.1
= control target key start
LH: loop header
LB: loop body
LE: loop exit
PB: predicated region body
PF: predicated region fallthrough
CT: control target
= control target key end

     0   :  { %vm25_vm0 = vcmask 261120   ;;  %v1999_v0 = vmov 0.0   ;;  %vm2000_vm1 = vmmov 0   ;;  %s2001_s23 = smov 64   ;;  %s2002_s24 = smov 32   ;;  %s2463_s1 = inlined_call_operand.vmem [shape: bf16[32,128], index: 1, kind: input, shape index: {}]   ;;  %s2464_s0 = inlined_call_operand.vmem [shape: f32[64,128], index: 0, kind: input, shape index: {}]   ;;  %s2465_s5 = inlined_call_operand.vmem [shape: f32[64,32], index: 5, kind: output, shape index: {}]   ;;  %s2466_s3 = inlined_call_operand.vmem [shape: bf16[32,128], index: 3, kind: input, shape index: {}]   ;;  %s2467_s2 = inlined_call_operand.vmem [shape: bf16[32,128], index: 2, kind: input, shape index: {}]   ;;  %s2468_s4 = inlined_call_operand.vmem [shape: f32[1,128], index: 4, kind: input, shape index: {}]  }
   0x1   :  { %1720 = vmatprep.subr.bf16.mxu0 %v1999_v0  ;;  %v2038_v1 = vld [vmem:[%s2463_s1 + $0x8] sm:$0xff]   ;;  %1724 = vmatprep.mubr.msk.bf16.mxu0 %vm2000_vm1, %v1999_v0  ;;  %26 = vst.msk [vmem:[#allocation3] sm:$0xff] %vm25_vm0, %v1999_v0  ;;  %27 = vst.msk [vmem:[#allocation3 + $0x8] sm:$0xff] %vm25_vm0, %v1999_v0  ;;  %v2057_v2 = vld [vmem:[%s2463_s1] sm:$0xff]   ;;  %s2003_s25 = smov 96  }
   0x2   :  { %28 = vst.msk [vmem:[#allocation4] sm:$0xff] %vm25_vm0, %v1999_v0  ;;  %29 = vst.msk [vmem:[#allocation4 + $0x8] sm:$0xff] %vm25_vm0, %v1999_v0  ;;  %1728 = vmatprep.subr.bf16.mxu1 %v1999_v0  ;;  %1732 = vmatprep.mubr.msk.bf16.mxu1 %vm2000_vm1, %v1999_v0  ;;  %v34_v5 = vld [vmem:[%s2464_s0] sm:$0xff]  ;;  %v1606_v31 = vld [vmem:[%s2464_s0 + $0x8] sm:$0xff] }
   0x3   :  { %1721 = vmatpush3.bf16.msra.mxu0 %v2038_v1  ;;  %1729 = vmatpush3.bf16.msra.mxu1 %v2038_v1  ;;  %v1610_v56 = vld [vmem:[%s2464_s0 + $0x10] sm:$0xff] }
   0x4   :  { %1722 = vmatprep.subr.bf16.mxu0 %v1999_v0  ;;  %1730 = vmatprep.subr.bf16.mxu1 %v1999_v0 }
   0x7   :  { %1723 = vmatpush3.bf16.msra.mxu0 %v2057_v2  ;;  %1731 = vmatpush3.bf16.msra.mxu1 %v2057_v2 }
   0x8   :  { %v35_v3 = vld [vmem:[#allocation3] sm:$0xff]  ;;  %1736 = vmatprep.subr.bf16.mxu0 %v1999_v0  ;;  %1744 = vmatprep.subr.bf16.mxu1 %v1999_v0 }
   0x9   :  { %v37_v4 = vpack.c.bf16 %v35_v3, %v35_v3  ;;  %v36_v12 = vld [vmem:[#allocation4] sm:$0xff] }
   0xb   :  { %1725 = vmatmul.mubr.msk.bf16.vlgmr.msra.gmra.mxu0 %vm25_vm0, %v37_v4 }
   0xc   :  { %1737 = vmatpush3.bf16.msra.mxu0 %v2038_v1  ;;  %1740 = vmatprep.mubr.msk.bf16.mxu0 %vm2000_vm1, %v1999_v0 }
   0xd   :  { %1738 = vmatprep.subr.bf16.mxu0 %v1999_v0 }
  0x10   :  { %1739 = vmatpush3.bf16.msra.mxu0 %v2057_v2 }
  0x11   :  { %1752 = vmatprep.subr.bf16.mxu0 %v1999_v0 }
  0xcb   :  { %v88_v6 = vpop.f32.mrf.mxu0 }
  0xcc   :  { %v94_v7 = vadd.f32 %v88_v6, %v34_v5 }
  0xcd   :  { %v1726_v8 = vpop.f32.mrf.mxu0 }
  0xce   :  { %1871 = vtanh.f32 %v94_v7  ;;  %v1605_v13 = vmul.f32 -1.442695, %v94_v7 }
  0xcf   :  { %v91_v9 = vpop.f32.mrf.mxu0 }
  0xd0   :  { %1873 = vpow2.f32 %v1605_v13 }
  0xd1   :  { %v1727_v10 = vpop.f32.mrf.mxu0 }
  0xdb   :  { %v1872_v11 = vpop.eup %1871 }
  0xdc   :  { %108 = vrot.lane.b32.xlu0 %v1872_v11, %s2001_s23 }
  0xdd   :  { %v1874_v14 = vpop.eup %1873 }
  0xde   :  { %v98_v15 = vadd.f32 1.0, %v1874_v14 }
  0xe0   :  { %103 = vrot.lane.b32.xlu0 %v36_v12, %s2002_s24  ;;  %1875 = vrcp.f32 %v98_v15 }
  0xed   :  { %v1876_v16 = vpop.eup %1875 }
 0x14e   :  { %v109_v17 = vpop.permute.xlu0 %108 }
 0x14f   :  { %v111_v18 = vmul.f32 %v1876_v16, %v109_v17 }
 0x151   :  { %113 = vrot.lane.b32.xlu1 %v111_v18, %s2002_s24 }
 0x152   :  { %v104_v19 = vpop.permute.xlu0 %103 }
 0x153   :  { %v106_v20 = vmul.f32 %v1876_v16, %v104_v19 }
 0x1c3   :  { %v114_v21 = vpop.permute.xlu1 %113 }
 0x1c4   :  { %v116_v22 = vadd.f32 %v114_v21, %v106_v20  ;;  %v1614_v20 = vld [vmem:[%s2464_s0 + $0x18] sm:$0xff] }
 0x1c6   :  { %1877 = vtanh.f32 %v116_v22 }
 0x1d3   :  { %v1878_v23 = vpop.eup %1877 }
 0x1d4   :  { %119 = vrot.lane.b32.xlu1 %v1878_v23, %s2001_s23 }
 0x1d8   :  { %124 = vrot.lane.b32.xlu1 %v116_v22, %s2003_s25 }
 0x246   :  { %v120_v24 = vpop.permute.xlu1 %119 }
 0x247   :  { %v122_v25 = vmul.f32 %v1876_v16, %v120_v24 }
 0x249   :  { %129 = vrot.lane.b32.xlu0 %v122_v25, %s2002_s24 }
 0x24a   :  { %v125_v26 = vpop.permute.xlu1 %124 }
 0x24b   :  { %127 = vst.msk [vmem:[#allocation4] sm:$0xff] %vm25_vm0, %v125_v26 }
 0x252   :  { %v137_v27 = vld [vmem:[#allocation4] sm:$0xff] }
 0x253   :  { %191 = vrot.lane.b32.xlu1 %v137_v27, %s2002_s24 }
 0x2bb   :  { %v130_v28 = vpop.permute.xlu0 %129 }
 0x2bc   :  { %132 = vst.msk [vmem:[#allocation3] sm:$0xff] %vm25_vm0, %v130_v28  ;;  %133 = vst.msk [vmem:[%s2465_s5] sm:$0xff] %vm25_vm0, %v130_v28 }
 0x2c3   :  { %v136_v29 = vld [vmem:[#allocation3] sm:$0xff] }
 0x2c4   :  { %v138_v30 = vpack.c.bf16 %v136_v29, %v136_v29 }
 0x2c5   :  { %v192_v44 = vpop.permute.xlu1 %191 }
 0x2c6   :  { %1733 = vmatmul.mubr.msk.bf16.vlgmr.msra.gmra.mxu1 %vm25_vm0, %v138_v30 }
 0x2c7   :  { %1745 = vmatpush3.bf16.msra.mxu1 %v2038_v1  ;;  %1748 = vmatprep.mubr.msk.bf16.mxu1 %vm2000_vm1, %v1999_v0 }
 0x2c8   :  { %1746 = vmatprep.subr.bf16.mxu1 %v1999_v0 }
 0x2cb   :  { %1747 = vmatpush3.bf16.msra.mxu1 %v2057_v2 }
 0x2cc   :  { %1760 = vmatprep.subr.bf16.mxu1 %v1999_v0 }
 0x386   :  { %v176_v32 = vpop.f32.mrf.mxu1 }
 0x387   :  { %v182_v33 = vadd.f32 %v1606_v31, %v176_v32 }
 0x388   :  { %v1734_v34 = vpop.f32.mrf.mxu1 }
 0x389   :  { %1879 = vtanh.f32 %v182_v33  ;;  %v1608_v38 = vmul.f32 -1.442695, %v182_v33 }
 0x38a   :  { %v179_v35 = vpop.f32.mrf.mxu1 }
 0x38b   :  { %1881 = vpow2.f32 %v1608_v38 }
 0x38c   :  { %v1735_v36 = vpop.f32.mrf.mxu1 }
 0x396   :  { %v1880_v37 = vpop.eup %1879 }
 0x397   :  { %196 = vrot.lane.b32.xlu0 %v1880_v37, %s2001_s23 }
 0x398   :  { %v1882_v39 = vpop.eup %1881 }
 0x399   :  { %v186_v40 = vadd.f32 1.0, %v1882_v39 }
 0x39b   :  { %1883 = vrcp.f32 %v186_v40 }
 0x3a8   :  { %v1884_v41 = vpop.eup %1883 }
 0x3a9   :  { %v194_v45 = vmul.f32 %v1884_v41, %v192_v44 }
 0x409   :  { %v197_v42 = vpop.permute.xlu0 %196 }
 0x40a   :  { %v199_v43 = vmul.f32 %v1884_v41, %v197_v42 }
 0x40c   :  { %201 = vrot.lane.b32.xlu0 %v199_v43, %s2002_s24 }
 0x47e   :  { %v202_v46 = vpop.permute.xlu0 %201 }
 0x47f   :  { %v204_v47 = vadd.f32 %v202_v46, %v194_v45  ;;  %v1618_v45 = vld [vmem:[%s2464_s0 + $0x20] sm:$0xff] }
 0x481   :  { %1885 = vtanh.f32 %v204_v47 }
 0x48e   :  { %v1886_v48 = vpop.eup %1885 }
 0x48f   :  { %207 = vrot.lane.b32.xlu1 %v1886_v48, %s2001_s23 }
 0x493   :  { %212 = vrot.lane.b32.xlu1 %v204_v47, %s2003_s25 }
 0x501   :  { %v208_v49 = vpop.permute.xlu1 %207 }
 0x502   :  { %v210_v50 = vmul.f32 %v1884_v41, %v208_v49 }
 0x504   :  { %217 = vrot.lane.b32.xlu0 %v210_v50, %s2002_s24 }
 0x505   :  { %v213_v51 = vpop.permute.xlu1 %212 }
 0x506   :  { %215 = vst.msk [vmem:[#allocation4] sm:$0xff] %vm25_vm0, %v213_v51 }
 0x50d   :  { %v226_v52 = vld [vmem:[#allocation4] sm:$0xff] }
 0x50e   :  { %280 = vrot.lane.b32.xlu1 %v226_v52, %s2002_s24 }
 0x576   :  { %v218_v53 = vpop.permute.xlu0 %217 }
 0x577   :  { %220 = vst.msk [vmem:[#allocation3] sm:$0xff] %vm25_vm0, %v218_v53  ;;  %1609 = vst.msk [vmem:[%s2465_s5 + $0x8] sm:$0xff] %vm25_vm0, %v218_v53 }
 0x57e   :  { %v225_v54 = vld [vmem:[#allocation3] sm:$0xff] }
 0x57f   :  { %v227_v55 = vpack.c.bf16 %v225_v54, %v225_v54 }
 0x580   :  { %v281_v8 = vpop.permute.xlu1 %280 }
 0x581   :  { %1741 = vmatmul.mubr.msk.bf16.vlgmr.msra.gmra.mxu0 %vm25_vm0, %v227_v55 }
 0x582   :  { %1753 = vmatpush3.bf16.msra.mxu0 %v2038_v1  ;;  %1756 = vmatprep.mubr.msk.bf16.mxu0 %vm2000_vm1, %v1999_v0 }
 0x583   :  { %1754 = vmatprep.subr.bf16.mxu0 %v1999_v0 }
 0x586   :  { %1755 = vmatpush3.bf16.msra.mxu0 %v2057_v2 }
 0x587   :  { %1768 = vmatprep.subr.bf16.mxu0 %v1999_v0 }
 0x641   :  { %v265_v57 = vpop.f32.mrf.mxu0 }
 0x642   :  { %v271_v58 = vadd.f32 %v1610_v56, %v265_v57 }
 0x643   :  { %v1742_v59 = vpop.f32.mrf.mxu0 }
 0x644   :  { %1887 = vtanh.f32 %v271_v58  ;;  %v1612_v63 = vmul.f32 -1.442695, %v271_v58 }
 0x645   :  { %v268_v60 = vpop.f32.mrf.mxu0 }
 0x646   :  { %1889 = vpow2.f32 %v1612_v63 }
 0x647   :  { %v1743_v61 = vpop.f32.mrf.mxu0 }
 0x651   :  { %v1888_v62 = vpop.eup %1887 }
 0x652   :  { %285 = vrot.lane.b32.xlu0 %v1888_v62, %s2001_s23 }
 0x653   :  { %v1890_v3 = vpop.eup %1889 }
 0x654   :  { %v275_v4 = vadd.f32 1.0, %v1890_v3 }
 0x656   :  { %1891 = vrcp.f32 %v275_v4 }
 0x663   :  { %v1892_v5 = vpop.eup %1891 }
 0x664   :  { %v283_v9 = vmul.f32 %v1892_v5, %v281_v8 }
 0x6c4   :  { %v286_v6 = vpop.permute.xlu0 %285 }
 0x6c5   :  { %v288_v7 = vmul.f32 %v1892_v5, %v286_v6 }
 0x6c7   :  { %290 = vrot.lane.b32.xlu0 %v288_v7, %s2002_s24 }
 0x739   :  { %v291_v10 = vpop.permute.xlu0 %290 }
 0x73a   :  { %v293_v11 = vadd.f32 %v291_v10, %v283_v9  ;;  %v1622_v9 = vld [vmem:[%s2464_s0 + $0x28] sm:$0xff] }
 0x73c   :  { %1893 = vtanh.f32 %v293_v11 }
 0x749   :  { %v1894_v12 = vpop.eup %1893 }
 0x74a   :  { %296 = vrot.lane.b32.xlu1 %v1894_v12, %s2001_s23 }
 0x74e   :  { %301 = vrot.lane.b32.xlu1 %v293_v11, %s2003_s25 }
 0x7bc   :  { %v297_v13 = vpop.permute.xlu1 %296 }
 0x7bd   :  { %v299_v14 = vmul.f32 %v1892_v5, %v297_v13 }
 0x7bf   :  { %306 = vrot.lane.b32.xlu0 %v299_v14, %s2002_s24 }
 0x7c0   :  { %v302_v15 = vpop.permute.xlu1 %301 }
 0x7c1   :  { %304 = vst.msk [vmem:[#allocation4] sm:$0xff] %vm25_vm0, %v302_v15 }
 0x7c8   :  { %v315_v16 = vld [vmem:[#allocation4] sm:$0xff] }
 0x7c9   :  { %369 = vrot.lane.b32.xlu1 %v315_v16, %s2002_s24 }
 0x831   :  { %v307_v17 = vpop.permute.xlu0 %306 }
 0x832   :  { %309 = vst.msk [vmem:[#allocation3] sm:$0xff] %vm25_vm0, %v307_v17  ;;  %1613 = vst.msk [vmem:[%s2465_s5 + $0x10] sm:$0xff] %vm25_vm0, %v307_v17 }
 0x839   :  { %v314_v18 = vld [vmem:[#allocation3] sm:$0xff] }
 0x83a   :  { %v316_v19 = vpack.c.bf16 %v314_v18, %v314_v18 }
 0x83b   :  { %v370_v33 = vpop.permute.xlu1 %369 }
 0x83c   :  { %1749 = vmatmul.mubr.msk.bf16.vlgmr.msra.gmra.mxu1 %vm25_vm0, %v316_v19 }
 0x83d   :  { %1761 = vmatpush3.bf16.msra.mxu1 %v2038_v1  ;;  %1764 = vmatprep.mubr.msk.bf16.mxu1 %vm2000_vm1, %v1999_v0 }
 0x83e   :  { %1762 = vmatprep.subr.bf16.mxu1 %v1999_v0 }
 0x841   :  { %1763 = vmatpush3.bf16.msra.mxu1 %v2057_v2 }
 0x842   :  { %1776 = vmatprep.subr.bf16.mxu1 %v1999_v0 }
 0x8fc   :  { %v354_v21 = vpop.f32.mrf.mxu1 }
 0x8fd   :  { %v360_v22 = vadd.f32 %v1614_v20, %v354_v21 }
 0x8fe   :  { %v1750_v23 = vpop.f32.mrf.mxu1 }
 0x8ff   :  { %1895 = vtanh.f32 %v360_v22  ;;  %v1616_v27 = vmul.f32 -1.442695, %v360_v22 }
 0x900   :  { %v357_v24 = vpop.f32.mrf.mxu1 }
 0x901   :  { %1897 = vpow2.f32 %v1616_v27 }
 0x902   :  { %v1751_v25 = vpop.f32.mrf.mxu1 }
 0x903   :  { %v1867_v25 = vld [vmem:[%s2466_s3 + $0x8] sm:$0xff]  }
 0x90c   :  { %v1896_v26 = vpop.eup %1895 }
 0x90d   :  { %374 = vrot.lane.b32.xlu0 %v1896_v26, %s2001_s23 }
 0x90e   :  { %v1898_v28 = vpop.eup %1897 }
 0x90f   :  { %v364_v29 = vadd.f32 1.0, %v1898_v28 }
 0x911   :  { %1899 = vrcp.f32 %v364_v29 }
 0x91e   :  { %v1900_v30 = vpop.eup %1899 }
 0x91f   :  { %v372_v34 = vmul.f32 %v1900_v30, %v370_v33 }
 0x97f   :  { %v375_v31 = vpop.permute.xlu0 %374 }
 0x980   :  { %v377_v32 = vmul.f32 %v1900_v30, %v375_v31  ;;  %v758_v31 = vld [vmem:[%s2465_s5 + $0x8] sm:$0xff] }
 0x982   :  { %379 = vrot.lane.b32.xlu0 %v377_v32, %s2002_s24 }
 0x9f4   :  { %v380_v35 = vpop.permute.xlu0 %379 }
 0x9f5   :  { %v382_v36 = vadd.f32 %v380_v35, %v372_v34  ;;  %v757_v34 = vld [vmem:[%s2465_s5] sm:$0xff] }
 0x9f6   :  { %v1868_v35 = vld [vmem:[%s2466_s3] sm:$0xff]  }
 0x9f7   :  { %1901 = vtanh.f32 %v382_v36 }
 0xa04   :  { %v1902_v37 = vpop.eup %1901 }
 0xa05   :  { %385 = vrot.lane.b32.xlu1 %v1902_v37, %s2001_s23 }
 0xa09   :  { %390 = vrot.lane.b32.xlu1 %v382_v36, %s2003_s25  ;;  %v765_v36 = vpack.c.bf16 %v758_v31, %v757_v34 }
 0xa77   :  { %v386_v38 = vpop.permute.xlu1 %385 }
 0xa78   :  { %v388_v39 = vmul.f32 %v1900_v30, %v386_v38 }
 0xa7a   :  { %395 = vrot.lane.b32.xlu0 %v388_v39, %s2002_s24  ;;  %v759_v39 = vld [vmem:[%s2465_s5 + $0x10] sm:$0xff] }
 0xa7b   :  { %v391_v40 = vpop.permute.xlu1 %390 }
 0xa7c   :  { %393 = vst.msk [vmem:[#allocation4] sm:$0xff] %vm25_vm0, %v391_v40 }
 0xa83   :  { %v404_v41 = vld [vmem:[#allocation4] sm:$0xff] }
 0xa84   :  { %458 = vrot.lane.b32.xlu1 %v404_v41, %s2002_s24 }
 0xaec   :  { %v396_v42 = vpop.permute.xlu0 %395 }
 0xaed   :  { %398 = vst.msk [vmem:[#allocation3] sm:$0xff] %vm25_vm0, %v396_v42  ;;  %1617 = vst.msk [vmem:[%s2465_s5 + $0x18] sm:$0xff] %vm25_vm0, %v396_v42 }
 0xaf4   :  { %v403_v43 = vld [vmem:[#allocation3] sm:$0xff]  ;;  %v760_v37 = vld [vmem:[%s2465_s5 + $0x18] sm:$0xff] }
 0xaf5   :  { %v405_v44 = vpack.c.bf16 %v403_v43, %v403_v43  ;;  %v766_v40 = vpack.c.bf16 %v760_v37, %v759_v39  ;;  %v1626_v43 = vld [vmem:[%s2464_s0 + $0x30] sm:$0xff] }
 0xaf6   :  { %v459_v58 = vpop.permute.xlu1 %458 }
 0xaf7   :  { %1757 = vmatmul.mubr.msk.bf16.vlgmr.msra.gmra.mxu0 %vm25_vm0, %v405_v44 }
 0xaf8   :  { %1769 = vmatpush3.bf16.msra.mxu0 %v2038_v1  ;;  %1772 = vmatprep.mubr.msk.bf16.mxu0 %vm2000_vm1, %v1999_v0 }
 0xaf9   :  { %1770 = vmatprep.subr.bf16.mxu0 %v1999_v0 }
 0xafc   :  { %1771 = vmatpush3.bf16.msra.mxu0 %v2057_v2 }
 0xafd   :  { %1784 = vmatprep.subr.bf16.mxu0 %v1867_v25 }
 0xbb7   :  { %v443_v46 = vpop.f32.mrf.mxu0 }
 0xbb8   :  { %v449_v47 = vadd.f32 %v1618_v45, %v443_v46 }
 0xbb9   :  { %v1758_v48 = vpop.f32.mrf.mxu0 }
 0xbba   :  { %1903 = vtanh.f32 %v449_v47  ;;  %v1620_v52 = vmul.f32 -1.442695, %v449_v47 }
 0xbbb   :  { %v446_v49 = vpop.f32.mrf.mxu0 }
 0xbbc   :  { %1905 = vpow2.f32 %v1620_v52 }
 0xbbd   :  { %v1759_v50 = vpop.f32.mrf.mxu0 }
 0xbc7   :  { %v1904_v51 = vpop.eup %1903 }
 0xbc8   :  { %463 = vrot.lane.b32.xlu0 %v1904_v51, %s2001_s23 }
 0xbc9   :  { %v1906_v53 = vpop.eup %1905 }
 0xbca   :  { %v453_v54 = vadd.f32 1.0, %v1906_v53 }
 0xbcc   :  { %1907 = vrcp.f32 %v453_v54 }
 0xbd9   :  { %v1908_v55 = vpop.eup %1907 }
 0xbda   :  { %v461_v59 = vmul.f32 %v1908_v55, %v459_v58 }
 0xc3a   :  { %v464_v56 = vpop.permute.xlu0 %463 }
 0xc3b   :  { %v466_v57 = vmul.f32 %v1908_v55, %v464_v56 }
 0xc3d   :  { %468 = vrot.lane.b32.xlu0 %v466_v57, %s2002_s24 }
 0xcaf   :  { %v469_v60 = vpop.permute.xlu0 %468 }
 0xcb0   :  { %v471_v61 = vadd.f32 %v469_v60, %v461_v59 }
 0xcb2   :  { %1909 = vtanh.f32 %v471_v61 }
 0xcbf   :  { %v1910_v62 = vpop.eup %1909 }
 0xcc0   :  { %474 = vrot.lane.b32.xlu1 %v1910_v62, %s2001_s23 }
 0xcc4   :  { %479 = vrot.lane.b32.xlu1 %v471_v61, %s2003_s25  ;;  %v2239_v61 = vld [vmem:[%s2467_s2 + $0x8] sm:$0xff]  }
 0xd32   :  { %v475_v63 = vpop.permute.xlu1 %474 }
 0xd33   :  { %v477_v3 = vmul.f32 %v1908_v55, %v475_v63 }
 0xd35   :  { %484 = vrot.lane.b32.xlu0 %v477_v3, %s2002_s24  ;;  %v2247_v3 = vld [vmem:[%s2467_s2] sm:$0xff]  }
 0xd36   :  { %v480_v4 = vpop.permute.xlu1 %479 }
 0xd37   :  { %482 = vst.msk [vmem:[#allocation4] sm:$0xff] %vm25_vm0, %v480_v4  ;;  %v885_v4 = vld [vmem:[#allocation4 + $0x8] sm:$0xff] }
 0xd3e   :  { %v493_v5 = vld [vmem:[#allocation4] sm:$0xff] }
 0xd3f   :  { %547 = vrot.lane.b32.xlu1 %v493_v5, %s2002_s24 }
 0xda7   :  { %v485_v6 = vpop.permute.xlu0 %484 }
 0xda8   :  { %487 = vst.msk [vmem:[#allocation3] sm:$0xff] %vm25_vm0, %v485_v6  ;;  %1621 = vst.msk [vmem:[%s2465_s5 + $0x20] sm:$0xff] %vm25_vm0, %v485_v6 }
 0xdaf   :  { %v492_v7 = vld [vmem:[#allocation3] sm:$0xff] }
 0xdb0   :  { %v494_v8 = vpack.c.bf16 %v492_v7, %v492_v7  ;;  %v761_v41 = vld [vmem:[%s2465_s5 + $0x20] sm:$0xff] }
 0xdb1   :  { %v548_v20 = vpop.permute.xlu1 %547 }
 0xdb2   :  { %1765 = vmatmul.mubr.msk.bf16.vlgmr.msra.gmra.mxu1 %vm25_vm0, %v494_v8  ;;  %v883_v8 = vld [vmem:[#allocation3 + $0x8] sm:$0xff] }
 0xdb3   :  { %1777 = vmatpush3.bf16.msra.mxu1 %v2038_v1  ;;  %1780 = vmatprep.mubr.msk.bf16.mxu1 %vm2000_vm1, %v1999_v0 }
 0xdb4   :  { %1778 = vmatprep.subr.bf16.mxu1 %v1999_v0 }
 0xdb7   :  { %1779 = vmatpush3.bf16.msra.mxu1 %v2057_v2 }
 0xdb8   :  { %1796 = vmatprep.subr.bf16.mxu1 %v1999_v0 }
 0xe72   :  { %v532_v10 = vpop.f32.mrf.mxu1 }
 0xe73   :  { %v538_v11 = vadd.f32 %v1622_v9, %v532_v10  ;;  %v886_v9 = vpack.c.bf16 %v883_v8, %v883_v8 }
 0xe74   :  { %v1766_v12 = vpop.f32.mrf.mxu1 }
 0xe75   :  { %1911 = vtanh.f32 %v538_v11  ;;  %v1624_v15 = vmul.f32 -1.442695, %v538_v11 }
 0xe76   :  { %v535_v13 = vpop.f32.mrf.mxu1 }
 0xe77   :  { %1913 = vpow2.f32 %v1624_v15 }
 0xe78   :  { %v1767_v14 = vpop.f32.mrf.mxu1 }
 0xe82   :  { %v1912_v1 = vpop.eup %1911 }
 0xe83   :  { %552 = vrot.lane.b32.xlu0 %v1912_v1, %s2001_s23  ;;  %v2276_v1 = vld [vmem:[%s2468_s4] ss:$0 sm:$0xff] }
 0xe84   :  { %v1914_v16 = vpop.eup %1913 }
 0xe85   :  { %v542_v17 = vadd.f32 1.0, %v1914_v16 }
 0xe87   :  { %1915 = vrcp.f32 %v542_v17 }
 0xe94   :  { %v1916_v2 = vpop.eup %1915 }
 0xe95   :  { %v550_v21 = vmul.f32 %v1916_v2, %v548_v20 }
 0xef5   :  { %v553_v18 = vpop.permute.xlu0 %552 }
 0xef6   :  { %v555_v19 = vmul.f32 %v1916_v2, %v553_v18 }
 0xef8   :  { %557 = vrot.lane.b32.xlu0 %v555_v19, %s2002_s24 }
 0xf6a   :  { %v558_v22 = vpop.permute.xlu0 %557 }
 0xf6b   :  { %v560_v23 = vadd.f32 %v558_v22, %v550_v21 }
 0xf6d   :  { %1917 = vtanh.f32 %v560_v23 }
 0xf7a   :  { %v1918_v24 = vpop.eup %1917 }
 0xf7b   :  { %563 = vrot.lane.b32.xlu1 %v1918_v24, %s2001_s23 }
 0xf7f   :  { %568 = vrot.lane.b32.xlu1 %v560_v23, %s2003_s25 }
 0xfed   :  { %v564_v26 = vpop.permute.xlu1 %563 }
 0xfee   :  { %v566_v27 = vmul.f32 %v1916_v2, %v564_v26 }
 0xff0   :  { %573 = vrot.lane.b32.xlu0 %v566_v27, %s2002_s24 }
 0xff1   :  { %v569_v28 = vpop.permute.xlu1 %568 }
 0xff2   :  { %571 = vst.msk [vmem:[#allocation4] sm:$0xff] %vm25_vm0, %v569_v28 }
 0xff9   :  { %v582_v29 = vld [vmem:[#allocation4] sm:$0xff] }
 0xffa   :  { %636 = vrot.lane.b32.xlu1 %v582_v29, %s2002_s24 }
0x1062   :  { %v574_v30 = vpop.permute.xlu0 %573 }
0x1063   :  { %576 = vst.msk [vmem:[#allocation3] sm:$0xff] %vm25_vm0, %v574_v30  ;;  %1625 = vst.msk [vmem:[%s2465_s5 + $0x28] sm:$0xff] %vm25_vm0, %v574_v30 }
0x106a   :  { %v581_v32 = vld [vmem:[#allocation3] sm:$0xff]  ;;  %v762_v38 = vld [vmem:[%s2465_s5 + $0x28] sm:$0xff] }
0x106b   :  { %v583_v33 = vpack.c.bf16 %v581_v32, %v581_v32  ;;  %v767_v42 = vpack.c.bf16 %v762_v38, %v761_v41 }
0x106c   :  { %v637_v56 = vpop.permute.xlu1 %636 }
0x106d   :  { %1773 = vmatmul.mubr.msk.bf16.vlgmr.msra.gmra.mxu0 %vm25_vm0, %v583_v33  ;;  %v1630_v33 = vld [vmem:[%s2464_s0 + $0x38] sm:$0xff] }
0x106e   :  { %1785 = vmatpush3.bf16.msra.mxu0 %v1867_v25  ;;  %1788 = vmatprep.mubr.msk.bf16.mxu0 %vm25_vm0, %v765_v36 }
0x106f   :  { %1786 = vmatprep.subr.bf16.mxu0 %v1868_v35 }
0x1072   :  { %1787 = vmatpush3.bf16.msra.mxu0 %v1868_v35 }
0x1073   :  { %1812 = vmatprep.subr.bf16.mxu0 %v1999_v0 }
0x1075   :  { %1789 = vmatmul.mubr.msk.bf16.vlgmr.msra.gmra.mxu0 %vm25_vm0, %v766_v40 }
0x1076   :  { %1792 = vmatprep.mubr.msk.bf16.mxu0 %vm25_vm0, %v767_v42  ;;  %1813 = vmatpush3.bf16.msra.mxu0 %v2239_v61 }
0x1077   :  { %1814 = vmatprep.subr.bf16.mxu0 %v1999_v0 }
0x107a   :  { %1815 = vmatpush3.bf16.msra.mxu0 %v2247_v3 }
0x107b   :  { %1828 = vmatprep.subr.bf16.mxu0 %v1999_v0 }
0x112d   :  { %v621_v44 = vpop.f32.mrf.mxu0 }
0x112e   :  { %v627_v45 = vadd.f32 %v1626_v43, %v621_v44 }
0x112f   :  { %v1774_v46 = vpop.f32.mrf.mxu0 }
0x1130   :  { %1919 = vtanh.f32 %v627_v45  ;;  %v1628_v50 = vmul.f32 -1.442695, %v627_v45 }
0x1131   :  { %v624_v47 = vpop.f32.mrf.mxu0 }
0x1132   :  { %1921 = vpow2.f32 %v1628_v50 }
0x1133   :  { %v1775_v48 = vpop.f32.mrf.mxu0 }
0x1135   :  { %v2271_v10 = vpop.f32.mrf.mxu0 }
0x1137   :  { %v838_v13 = vpop.f32.mrf.mxu0 }
0x1138   :  { %v839_v16 = vadd.f32 %v2276_v1, %v838_v13 }
0x1139   :  { %v2306_v46 = vpop.f32.mrf.mxu0 }
0x113b   :  { %v841_v47 = vpop.f32.mrf.mxu0 }
0x113d   :  { %v1920_v49 = vpop.eup %1919 }
0x113e   :  { %641 = vrot.lane.b32.xlu0 %v1920_v49, %s2001_s23  ;;  %v842_v49 = vadd.f32 %v2276_v1, %v841_v47 }
0x113f   :  { %v1922_v51 = vpop.eup %1921 }
0x1140   :  { %v631_v52 = vadd.f32 1.0, %v1922_v51 }
0x1142   :  { %1923 = vrcp.f32 %v631_v52 }
0x114f   :  { %v1924_v53 = vpop.eup %1923 }
0x1150   :  { %v639_v57 = vmul.f32 %v1924_v53, %v637_v56 }
0x11b0   :  { %v642_v54 = vpop.permute.xlu0 %641 }
0x11b1   :  { %v644_v55 = vmul.f32 %v1924_v53, %v642_v54 }
0x11b3   :  { %646 = vrot.lane.b32.xlu0 %v644_v55, %s2002_s24 }
0x1225   :  { %v647_v58 = vpop.permute.xlu0 %646 }
0x1226   :  { %v2232_v59 = vadd.f32 %v647_v58, %v639_v57 }
0x1228   :  { %1925 = vtanh.f32 %v2232_v59 }
0x1235   :  { %v1926_v60 = vpop.eup %1925 }
0x1236   :  { %652 = vrot.lane.b32.xlu1 %v1926_v60, %s2001_s23 }
0x12a8   :  { %v653_v62 = vpop.permute.xlu1 %652 }
0x12a9   :  { %v655_v63 = vmul.f32 %v1924_v53, %v653_v62 }
0x12ab   :  { %662 = vrot.lane.b32.xlu0 %v655_v63, %s2002_s24 }
0x12af   :  { %951 = vrot.lane.b32.xlu0 %v885_v4, %s2002_s24 }
0x131d   :  { %v663_v5 = vpop.permute.xlu0 %662 }
0x131e   :  { %665 = vst.msk [vmem:[#allocation3] sm:$0xff] %vm25_vm0, %v663_v5  ;;  %1629 = vst.msk [vmem:[%s2465_s5 + $0x30] sm:$0xff] %vm25_vm0, %v663_v5 }
0x1321   :  { %v952_v28 = vpop.permute.xlu0 %951 }
0x1325   :  { %v670_v6 = vld [vmem:[#allocation3] sm:$0xff] }
0x1326   :  { %v672_v7 = vpack.c.bf16 %v670_v6, %v670_v6 }
0x1328   :  { %1781 = vmatmul.mubr.msk.bf16.vlgmr.msra.gmra.mxu1 %vm25_vm0, %v672_v7 }
0x1329   :  { %1797 = vmatpush3.bf16.msra.mxu1 %v2239_v61  ;;  %1800 = vmatprep.mubr.msk.bf16.mxu1 %vm2000_vm1, %v1999_v0 }
0x132a   :  { %1798 = vmatprep.subr.bf16.mxu1 %v1999_v0 }
0x132d   :  { %1799 = vmatpush3.bf16.msra.mxu1 %v2247_v3 }
0x132e   :  { %1804 = vmatprep.subr.bf16.mxu1 %v1999_v0 }
0x1330   :  { %1801 = vmatmul.mubr.msk.bf16.vlgmr.msra.gmra.mxu1 %vm25_vm0, %v886_v9 }
0x1331   :  { %1805 = vmatpush3.bf16.msra.mxu1 %v2239_v61  ;;  %1808 = vmatprep.mubr.msk.bf16.mxu1 %vm2000_vm1, %v1999_v0 }
0x1332   :  { %1806 = vmatprep.subr.bf16.mxu1 %v1999_v0 }
0x1335   :  { %1807 = vmatpush3.bf16.msra.mxu1 %v2247_v3 }
0x1336   :  { %1820 = vmatprep.subr.bf16.mxu1 %v1999_v0 }
0x13e8   :  { %v710_v11 = vpop.f32.mrf.mxu1 }
0x13e9   :  { %v716_v34 = vadd.f32 %v1630_v33, %v710_v11 }
0x13ea   :  { %v1782_v12 = vpop.f32.mrf.mxu1 }
0x13eb   :  { %v1632_v45 = vmul.f32 -1.442695, %v716_v34 }
0x13ec   :  { %v713_v14 = vpop.f32.mrf.mxu1 }
0x13ee   :  { %v1783_v15 = vpop.f32.mrf.mxu1 }
0x13f0   :  { %v936_v17 = vpop.f32.mrf.mxu1 }
0x13f1   :  { %v942_v2 = vadd.f32 %v936_v17, %v839_v16 }
0x13f2   :  { %v1802_v18 = vpop.f32.mrf.mxu1 }
0x13f3   :  { %1927 = vtanh.f32 %v942_v2  ;;  %v1644_v22 = vmul.f32 -1.442695, %v942_v2 }
0x13f4   :  { %v939_v19 = vpop.f32.mrf.mxu1 }
0x13f5   :  { %1929 = vpow2.f32 %v1644_v22 }
0x13f6   :  { %v1803_v20 = vpop.f32.mrf.mxu1 }
0x1400   :  { %v1928_v21 = vpop.eup %1927 }
0x1401   :  { %956 = vrot.lane.b32.xlu1 %v1928_v21, %s2001_s23 }
0x1402   :  { %v1930_v23 = vpop.eup %1929 }
0x1403   :  { %v946_v24 = vadd.f32 1.0, %v1930_v23  ;;  %v763_v23 = vld [vmem:[%s2465_s5 + $0x30] sm:$0xff] }
0x1405   :  { %1931 = vrcp.f32 %v946_v24 }
0x1412   :  { %v1932_v25 = vpop.eup %1931 }
0x1413   :  { %v954_v29 = vmul.f32 %v1932_v25, %v952_v28 }
0x1473   :  { %v957_v26 = vpop.permute.xlu1 %956 }
0x1474   :  { %v959_v27 = vmul.f32 %v1932_v25, %v957_v26 }
0x1476   :  { %961 = vrot.lane.b32.xlu1 %v959_v27, %s2002_s24 }
0x14e8   :  { %v962_v30 = vpop.permute.xlu1 %961 }
0x14e9   :  { %v964_v31 = vadd.f32 %v962_v30, %v954_v29 }
0x14eb   :  { %1933 = vtanh.f32 %v964_v31 }
0x14ec   :  { %1935 = vtanh.f32 %v716_v34  ;;  %v847_v34 = vadd.f32 %v2271_v10, %v2276_v1 }
0x14ed   :  { %1937 = vpow2.f32 %v1632_v45 }
0x14f8   :  { %v1934_v32 = vpop.eup %1933 }
0x14f9   :  { %967 = vrot.lane.b32.xlu0 %v1934_v32, %s2001_s23  ;;  %v1936_v38 = vpop.eup %1935 }
0x14fa   :  { %v1938_v48 = vpop.eup %1937 }
0x14fb   :  { %v720_v51 = vadd.f32 1.0, %v1938_v48 }
0x14fd   :  { %657 = vrot.lane.b32.xlu0 %v2232_v59, %s2003_s25 }
0x1501   :  { %972 = vrot.lane.b32.xlu0 %v964_v31, %s2003_s25 }
0x156b   :  { %v968_v35 = vpop.permute.xlu0 %967 }
0x156c   :  { %v970_v36 = vmul.f32 %v1932_v25, %v968_v35 }
0x156e   :  { %977 = vrot.lane.b32.xlu1 %v970_v36, %s2002_s24 }
0x156f   :  { %v658_v37 = vpop.permute.xlu0 %657 }
0x1570   :  { %660 = vst.msk [vmem:[#allocation4] sm:$0xff] %vm25_vm0, %v658_v37 }
0x1572   :  { %730 = vrot.lane.b32.xlu1 %v1936_v38, %s2001_s23 }
0x1573   :  { %v973_v39 = vpop.permute.xlu0 %972 }
0x1574   :  { %975 = vst.msk [vmem:[#allocation4 + $0x8] sm:$0xff] %vm25_vm0, %v973_v39 }
0x1577   :  { %v671_v40 = vld [vmem:[#allocation4] sm:$0xff] }
0x1578   :  { %725 = vrot.lane.b32.xlu0 %v671_v40, %s2002_s24 }
0x157b   :  { %v985_v41 = vld [vmem:[#allocation4 + $0x8] sm:$0xff] }
0x157c   :  { %1039 = vrot.lane.b32.xlu0 %v985_v41, %s2002_s24 }
0x15e0   :  { %v978_v42 = vpop.permute.xlu1 %977 }
0x15e1   :  { %980 = vst.msk [vmem:[#allocation3 + $0x8] sm:$0xff] %vm25_vm0, %v978_v42  ;;  %981 = vst.msk [vmem:[%s2465_s5] sm:$0xff] %vm25_vm0, %v978_v42 }
0x15e4   :  { %v731_v57 = vpop.permute.xlu1 %730 }
0x15e8   :  { %v984_v43 = vld [vmem:[#allocation3 + $0x8] sm:$0xff] }
0x15e9   :  { %v986_v44 = vpack.c.bf16 %v984_v43, %v984_v43 }
0x15ea   :  { %v726_v5 = vpop.permute.xlu0 %725 }
0x15eb   :  { %1809 = vmatmul.mubr.msk.bf16.vlgmr.msra.gmra.mxu1 %vm25_vm0, %v986_v44 }
0x15ec   :  { %1821 = vmatpush3.bf16.msra.mxu1 %v2239_v61  ;;  %1824 = vmatprep.mubr.msk.bf16.mxu1 %vm2000_vm1, %v1999_v0 }
0x15ed   :  { %1822 = vmatprep.subr.bf16.mxu1 %v1999_v0 }
0x15ee   :  { %v1040_v13 = vpop.permute.xlu0 %1039 }
0x15f0   :  { %1823 = vmatpush3.bf16.msra.mxu1 %v2247_v3 }
0x15f1   :  { %1836 = vmatprep.subr.bf16.mxu1 %v1999_v0 }
0x16ab   :  { %v1024_v50 = vpop.f32.mrf.mxu1 }
0x16ac   :  { %v1030_v52 = vadd.f32 %v1024_v50, %v842_v49 }
0x16ad   :  { %v1810_v53 = vpop.f32.mrf.mxu1 }
0x16ae   :  { %1939 = vtanh.f32 %v1030_v52  ;;  %v1646_v60 = vmul.f32 -1.442695, %v1030_v52 }
0x16af   :  { %v1027_v54 = vpop.f32.mrf.mxu1  ;;  %1941 = vrcp.f32 %v720_v51 }
0x16b0   :  { %1943 = vpow2.f32 %v1646_v60 }
0x16b1   :  { %v1811_v55 = vpop.f32.mrf.mxu1 }
0x16bb   :  { %v1940_v56 = vpop.eup %1939 }
0x16bc   :  { %1044 = vrot.lane.b32.xlu1 %v1940_v56, %s2001_s23  ;;  %v1942_v58 = vpop.eup %1941 }
0x16bd   :  { %v733_v59 = vmul.f32 %v1942_v58, %v731_v57  ;;  %v1944_v62 = vpop.eup %1943  ;;  %v728_v8 = vmul.f32 %v1942_v58, %v726_v5 }
0x16be   :  { %v1034_v63 = vadd.f32 1.0, %v1944_v62 }
0x16c0   :  { %735 = vrot.lane.b32.xlu1 %v733_v59, %s2002_s24  ;;  %1945 = vrcp.f32 %v1034_v63  ;;  %v850_v59 = vadd.f32 %v2306_v46, %v2276_v1 }
0x16cd   :  { %v1946_v4 = vpop.eup %1945 }
0x16ce   :  { %v1042_v14 = vmul.f32 %v1946_v4, %v1040_v13 }
0x172e   :  { %v1045_v6 = vpop.permute.xlu1 %1044 }
0x172f   :  { %v1047_v7 = vmul.f32 %v1946_v4, %v1045_v6 }
0x1731   :  { %1049 = vrot.lane.b32.xlu1 %v1047_v7, %s2002_s24 }
0x1732   :  { %v736_v9 = vpop.permute.xlu1 %735 }
0x1733   :  { %v2312_v11 = vadd.f32 %v736_v9, %v728_v8 }
0x1735   :  { %1947 = vtanh.f32 %v2312_v11 }
0x1742   :  { %v1948_v12 = vpop.eup %1947 }
0x1743   :  { %741 = vrot.lane.b32.xlu0 %v1948_v12, %s2001_s23 }
0x17a3   :  { %v1050_v15 = vpop.permute.xlu1 %1049 }
0x17a4   :  { %v1052_v16 = vadd.f32 %v1050_v15, %v1042_v14 }
0x17a6   :  { %1949 = vtanh.f32 %v1052_v16 }
0x17b3   :  { %v1950_v17 = vpop.eup %1949 }
0x17b4   :  { %1055 = vrot.lane.b32.xlu1 %v1950_v17, %s2001_s23 }
0x17b5   :  { %v742_v2 = vpop.permute.xlu0 %741 }
0x17b6   :  { %v744_v18 = vmul.f32 %v1942_v58, %v742_v2 }
0x17b8   :  { %751 = vrot.lane.b32.xlu0 %v744_v18, %s2002_s24 }
0x17bc   :  { %1060 = vrot.lane.b32.xlu0 %v1052_v16, %s2003_s25 }
0x1826   :  { %v1056_v19 = vpop.permute.xlu1 %1055 }
0x1827   :  { %v1058_v20 = vmul.f32 %v1946_v4, %v1056_v19 }
0x1829   :  { %1065 = vrot.lane.b32.xlu1 %v1058_v20, %s2002_s24 }
0x182a   :  { %v752_v21 = vpop.permute.xlu0 %751 }
0x182b   :  { %754 = vst.msk [vmem:[#allocation3] sm:$0xff] %vm25_vm0, %v752_v21  ;;  %1633 = vst.msk [vmem:[%s2465_s5 + $0x38] sm:$0xff] %vm25_vm0, %v752_v21 }
0x182e   :  { %v1061_v22 = vpop.permute.xlu0 %1060 }
0x182f   :  { %1063 = vst.msk [vmem:[#allocation4 + $0x8] sm:$0xff] %vm25_vm0, %v1061_v22 }
0x1832   :  { %v764_v24 = vld [vmem:[%s2465_s5 + $0x38] sm:$0xff] }
0x1833   :  { %v768_v25 = vpack.c.bf16 %v764_v24, %v763_v23 }
0x1835   :  { %1793 = vmatmul.mubr.msk.bf16.gmra.mxu0 %vm25_vm0, %v768_v25 }
0x1836   :  { %v1073_v26 = vld [vmem:[#allocation4 + $0x8] sm:$0xff]  ;;  %1816 = vmatprep.mubr.msk.bf16.mxu0 %vm2000_vm1, %v1999_v0 }
0x1837   :  { %1127 = vrot.lane.b32.xlu0 %v1073_v26, %s2002_s24 }
0x189b   :  { %v1066_v27 = vpop.permute.xlu1 %1065 }
0x189c   :  { %1068 = vst.msk [vmem:[#allocation3 + $0x8] sm:$0xff] %vm25_vm0, %v1066_v27  ;;  %1647 = vst.msk [vmem:[%s2465_s5 + $0x8] sm:$0xff] %vm25_vm0, %v1066_v27 }
0x18a3   :  { %v1072_v28 = vld [vmem:[#allocation3 + $0x8] sm:$0xff] }
0x18a4   :  { %v1074_v29 = vpack.c.bf16 %v1072_v28, %v1072_v28 }
0x18a6   :  { %1817 = vmatmul.mubr.msk.bf16.vlgmr.msra.gmra.mxu0 %vm25_vm0, %v1074_v29 }
0x18a7   :  { %1829 = vmatpush3.bf16.msra.mxu0 %v2239_v61  ;;  %1832 = vmatprep.mubr.msk.bf16.mxu0 %vm2000_vm1, %v1999_v0 }
0x18a8   :  { %1830 = vmatprep.subr.bf16.mxu0 %v1999_v0 }
0x18a9   :  { %v1128_v10 = vpop.permute.xlu0 %1127 }
0x18ab   :  { %1831 = vmatpush3.bf16.msra.mxu0 %v2247_v3 }
0x18ac   :  { %1844 = vmatprep.subr.bf16.mxu0 %v1999_v0 }
0x18f5   :  { %v2348_v30 = vpop.f32.mrf.mxu0 }
0x18f7   :  { %v2350_v31 = vpop.f32.mrf.mxu0 }
0x18f8   :  { %v855_v25 = vadd.f32 %v2276_v1, %v2350_v31 }
0x18f9   :  { %v2352_v32 = vpop.f32.mrf.mxu0 }
0x18fb   :  { %v2354_v33 = vpop.f32.mrf.mxu0 }
0x1966   :  { %v1112_v35 = vpop.f32.mrf.mxu0 }
0x1967   :  { %v1118_v36 = vadd.f32 %v1112_v35, %v847_v34 }
0x1968   :  { %v1818_v37 = vpop.f32.mrf.mxu0 }
0x1969   :  { %1951 = vtanh.f32 %v1118_v36  ;;  %v1649_v41 = vmul.f32 -1.442695, %v1118_v36 }
0x196a   :  { %v1115_v38 = vpop.f32.mrf.mxu0 }
0x196b   :  { %1953 = vpow2.f32 %v1649_v41 }
0x196c   :  { %v1819_v39 = vpop.f32.mrf.mxu0 }
0x1976   :  { %v1952_v40 = vpop.eup %1951 }
0x1977   :  { %1132 = vrot.lane.b32.xlu1 %v1952_v40, %s2001_s23 }
0x1978   :  { %v1954_v42 = vpop.eup %1953 }
0x1979   :  { %v1122_v43 = vadd.f32 1.0, %v1954_v42 }
0x197b   :  { %1955 = vrcp.f32 %v1122_v43 }
0x1988   :  { %v1956_v44 = vpop.eup %1955 }
0x1989   :  { %v1130_v48 = vmul.f32 %v1956_v44, %v1128_v10 }
0x19e9   :  { %v1133_v45 = vpop.permute.xlu1 %1132 }
0x19ea   :  { %v1135_v47 = vmul.f32 %v1956_v44, %v1133_v45 }
0x19ec   :  { %1137 = vrot.lane.b32.xlu1 %v1135_v47, %s2002_s24 }
0x1a5e   :  { %v1138_v49 = vpop.permute.xlu1 %1137 }
0x1a5f   :  { %v1140_v50 = vadd.f32 %v1138_v49, %v1130_v48 }
0x1a61   :  { %1957 = vtanh.f32 %v1140_v50 }
0x1a6e   :  { %v1958_v51 = vpop.eup %1957 }
0x1a6f   :  { %1143 = vrot.lane.b32.xlu0 %v1958_v51, %s2001_s23 }
0x1a73   :  { %1148 = vrot.lane.b32.xlu0 %v1140_v50, %s2003_s25 }
0x1ae1   :  { %v1144_v52 = vpop.permute.xlu0 %1143 }
0x1ae2   :  { %v1146_v53 = vmul.f32 %v1956_v44, %v1144_v52 }
0x1ae4   :  { %1153 = vrot.lane.b32.xlu1 %v1146_v53, %s2002_s24  ;;  %v858_v53 = vadd.f32 %v2276_v1, %v2354_v33 }
0x1ae5   :  { %v1149_v54 = vpop.permute.xlu0 %1148 }
0x1ae6   :  { %1151 = vst.msk [vmem:[#allocation4 + $0x8] sm:$0xff] %vm25_vm0, %v1149_v54 }
0x1aed   :  { %v1161_v55 = vld [vmem:[#allocation4 + $0x8] sm:$0xff] }
0x1aee   :  { %1215 = vrot.lane.b32.xlu0 %v1161_v55, %s2002_s24 }
0x1b56   :  { %v1154_v56 = vpop.permute.xlu1 %1153 }
0x1b57   :  { %1156 = vst.msk [vmem:[#allocation3 + $0x8] sm:$0xff] %vm25_vm0, %v1154_v56  ;;  %1650 = vst.msk [vmem:[%s2465_s5 + $0x10] sm:$0xff] %vm25_vm0, %v1154_v56 }
0x1b5e   :  { %v1160_v57 = vld [vmem:[#allocation3 + $0x8] sm:$0xff] }
0x1b5f   :  { %v1162_v58 = vpack.c.bf16 %v1160_v57, %v1160_v57 }
0x1b60   :  { %v1216_v46 = vpop.permute.xlu0 %1215 }
0x1b61   :  { %1825 = vmatmul.mubr.msk.bf16.vlgmr.msra.gmra.mxu1 %vm25_vm0, %v1162_v58 }
0x1b62   :  { %1837 = vmatpush3.bf16.msra.mxu1 %v2239_v61  ;;  %1840 = vmatprep.mubr.msk.bf16.mxu1 %vm2000_vm1, %v1999_v0 }
0x1b63   :  { %1838 = vmatprep.subr.bf16.mxu1 %v1999_v0 }
0x1b66   :  { %1839 = vmatpush3.bf16.msra.mxu1 %v2247_v3 }
0x1b67   :  { %1852 = vmatprep.subr.bf16.mxu1 %v1999_v0 }
0x1c21   :  { %v1200_v60 = vpop.f32.mrf.mxu1 }
0x1c22   :  { %v1206_v62 = vadd.f32 %v1200_v60, %v850_v59 }
0x1c23   :  { %v1826_v63 = vpop.f32.mrf.mxu1 }
0x1c24   :  { %1959 = vtanh.f32 %v1206_v62  ;;  %v1652_v7 = vmul.f32 -1.442695, %v1206_v62 }
0x1c25   :  { %v1203_v4 = vpop.f32.mrf.mxu1 }
0x1c26   :  { %1961 = vpow2.f32 %v1652_v7 }
0x1c27   :  { %v1827_v5 = vpop.f32.mrf.mxu1 }
0x1c31   :  { %v1960_v6 = vpop.eup %1959 }
0x1c32   :  { %1220 = vrot.lane.b32.xlu1 %v1960_v6, %s2001_s23 }
0x1c33   :  { %v1962_v8 = vpop.eup %1961 }
0x1c34   :  { %v1210_v9 = vadd.f32 1.0, %v1962_v8 }
0x1c36   :  { %1963 = vrcp.f32 %v1210_v9 }
0x1c43   :  { %v1964_v12 = vpop.eup %1963 }
0x1c44   :  { %v1218_v15 = vmul.f32 %v1964_v12, %v1216_v46 }
0x1ca4   :  { %v1221_v13 = vpop.permute.xlu1 %1220 }
0x1ca5   :  { %v1223_v14 = vmul.f32 %v1964_v12, %v1221_v13 }
0x1ca7   :  { %1225 = vrot.lane.b32.xlu1 %v1223_v14, %s2002_s24 }
0x1d19   :  { %v1226_v16 = vpop.permute.xlu1 %1225 }
0x1d1a   :  { %v1228_v17 = vadd.f32 %v1226_v16, %v1218_v15  ;;  %v863_v16 = vadd.f32 %v2348_v30, %v2276_v1 }
0x1d1c   :  { %1965 = vtanh.f32 %v1228_v17 }
0x1d29   :  { %v1966_v2 = vpop.eup %1965 }
0x1d2a   :  { %1231 = vrot.lane.b32.xlu0 %v1966_v2, %s2001_s23 }
0x1d2e   :  { %1236 = vrot.lane.b32.xlu0 %v1228_v17, %s2003_s25 }
0x1d9c   :  { %v1232_v18 = vpop.permute.xlu0 %1231 }
0x1d9d   :  { %v1234_v19 = vmul.f32 %v1964_v12, %v1232_v18 }
0x1d9f   :  { %1241 = vrot.lane.b32.xlu1 %v1234_v19, %s2002_s24 }
0x1da0   :  { %v1237_v20 = vpop.permute.xlu0 %1236 }
0x1da1   :  { %1239 = vst.msk [vmem:[#allocation4 + $0x8] sm:$0xff] %vm25_vm0, %v1237_v20 }
0x1da8   :  { %v1249_v21 = vld [vmem:[#allocation4 + $0x8] sm:$0xff] }
0x1da9   :  { %1303 = vrot.lane.b32.xlu0 %v1249_v21, %s2002_s24 }
0x1e11   :  { %v1242_v22 = vpop.permute.xlu1 %1241 }
0x1e12   :  { %1244 = vst.msk [vmem:[#allocation3 + $0x8] sm:$0xff] %vm25_vm0, %v1242_v22  ;;  %1653 = vst.msk [vmem:[%s2465_s5 + $0x18] sm:$0xff] %vm25_vm0, %v1242_v22 }
0x1e19   :  { %v1248_v23 = vld [vmem:[#allocation3 + $0x8] sm:$0xff] }
0x1e1a   :  { %v1250_v24 = vpack.c.bf16 %v1248_v23, %v1248_v23 }
0x1e1b   :  { %v1304_v31 = vpop.permute.xlu0 %1303 }
0x1e1c   :  { %1833 = vmatmul.mubr.msk.bf16.vlgmr.msra.gmra.mxu0 %vm25_vm0, %v1250_v24 }
0x1e1d   :  { %1845 = vmatpush3.bf16.msra.mxu0 %v2239_v61  ;;  %1848 = vmatprep.mubr.msk.bf16.mxu0 %vm2000_vm1, %v1999_v0 }
0x1e1e   :  { %1846 = vmatprep.subr.bf16.mxu0 %v1999_v0 }
0x1e21   :  { %1847 = vmatpush3.bf16.msra.mxu0 %v2247_v3 }
0x1edc   :  { %v1288_v26 = vpop.f32.mrf.mxu0 }
0x1edd   :  { %v1294_v27 = vadd.f32 %v1288_v26, %v855_v25 }
0x1ede   :  { %v1834_v28 = vpop.f32.mrf.mxu0 }
0x1edf   :  { %1967 = vtanh.f32 %v1294_v27  ;;  %v1655_v36 = vmul.f32 -1.442695, %v1294_v27 }
0x1ee0   :  { %v1291_v29 = vpop.f32.mrf.mxu0 }
0x1ee1   :  { %1969 = vpow2.f32 %v1655_v36 }
0x1ee2   :  { %v1835_v34 = vpop.f32.mrf.mxu0 }
0x1eec   :  { %v1968_v35 = vpop.eup %1967 }
0x1eed   :  { %1308 = vrot.lane.b32.xlu1 %v1968_v35, %s2001_s23 }
0x1eee   :  { %v1970_v37 = vpop.eup %1969 }
0x1eef   :  { %v1298_v38 = vadd.f32 1.0, %v1970_v37 }
0x1ef1   :  { %1971 = vrcp.f32 %v1298_v38 }
0x1efe   :  { %v1972_v39 = vpop.eup %1971 }
0x1eff   :  { %v1306_v42 = vmul.f32 %v1972_v39, %v1304_v31 }
0x1f5f   :  { %v1309_v40 = vpop.permute.xlu1 %1308 }
0x1f60   :  { %v1311_v41 = vmul.f32 %v1972_v39, %v1309_v40 }
0x1f62   :  { %1313 = vrot.lane.b32.xlu1 %v1311_v41, %s2002_s24 }
0x1fd4   :  { %v1314_v43 = vpop.permute.xlu1 %1313 }
0x1fd5   :  { %v1316_v44 = vadd.f32 %v1314_v43, %v1306_v42  ;;  %v866_v42 = vadd.f32 %v2352_v32, %v2276_v1 }
0x1fd7   :  { %1973 = vtanh.f32 %v1316_v44 }
0x1fe4   :  { %v1974_v45 = vpop.eup %1973 }
0x1fe5   :  { %1319 = vrot.lane.b32.xlu0 %v1974_v45, %s2001_s23 }
0x1fe9   :  { %1324 = vrot.lane.b32.xlu0 %v1316_v44, %s2003_s25 }
0x2057   :  { %v1320_v47 = vpop.permute.xlu0 %1319 }
0x2058   :  { %v1322_v10 = vmul.f32 %v1972_v39, %v1320_v47 }
0x205a   :  { %1329 = vrot.lane.b32.xlu1 %v1322_v10, %s2002_s24 }
0x205b   :  { %v1325_v48 = vpop.permute.xlu0 %1324 }
0x205c   :  { %1327 = vst.msk [vmem:[#allocation4 + $0x8] sm:$0xff] %vm25_vm0, %v1325_v48 }
0x2063   :  { %v1337_v49 = vld [vmem:[#allocation4 + $0x8] sm:$0xff] }
0x2064   :  { %1391 = vrot.lane.b32.xlu0 %v1337_v49, %s2002_s24 }
0x20cc   :  { %v1330_v50 = vpop.permute.xlu1 %1329 }
0x20cd   :  { %1332 = vst.msk [vmem:[#allocation3 + $0x8] sm:$0xff] %vm25_vm0, %v1330_v50  ;;  %1656 = vst.msk [vmem:[%s2465_s5 + $0x20] sm:$0xff] %vm25_vm0, %v1330_v50 }
0x20d4   :  { %v1336_v51 = vld [vmem:[#allocation3 + $0x8] sm:$0xff] }
0x20d5   :  { %v1338_v52 = vpack.c.bf16 %v1336_v51, %v1336_v51 }
0x20d6   :  { %v1392_v33 = vpop.permute.xlu0 %1391 }
0x20d7   :  { %1841 = vmatmul.mubr.msk.bf16.vlgmr.msra.gmra.mxu1 %vm25_vm0, %v1338_v52 }
0x20d8   :  { %1853 = vmatpush3.bf16.msra.mxu1 %v2239_v61  ;;  %1856 = vmatprep.mubr.msk.bf16.mxu1 %vm2000_vm1, %v1999_v0 }
0x20d9   :  { %1854 = vmatprep.subr.bf16.mxu1 %v1999_v0 }
0x20dc   :  { %1855 = vmatpush3.bf16.msra.mxu1 %v2247_v3 }
0x2197   :  { %v1376_v54 = vpop.f32.mrf.mxu1 }
0x2198   :  { %v1382_v55 = vadd.f32 %v1376_v54, %v858_v53 }
0x2199   :  { %v1842_v56 = vpop.f32.mrf.mxu1 }
0x219a   :  { %1975 = vtanh.f32 %v1382_v55  ;;  %v1658_v61 = vmul.f32 -1.442695, %v1382_v55 }
0x219b   :  { %v1379_v57 = vpop.f32.mrf.mxu1 }
0x219c   :  { %1977 = vpow2.f32 %v1658_v61 }
0x219d   :  { %v1843_v58 = vpop.f32.mrf.mxu1 }
0x21a7   :  { %v1976_v59 = vpop.eup %1975 }
0x21a8   :  { %1396 = vrot.lane.b32.xlu1 %v1976_v59, %s2001_s23 }
0x21a9   :  { %v1978_v60 = vpop.eup %1977 }
0x21aa   :  { %v1386_v62 = vadd.f32 1.0, %v1978_v60 }
0x21ac   :  { %1979 = vrcp.f32 %v1386_v62 }
0x21b9   :  { %v1980_v0 = vpop.eup %1979 }
0x21ba   :  { %v1394_v4 = vmul.f32 %v1980_v0, %v1392_v33 }
0x221a   :  { %v1397_v63 = vpop.permute.xlu1 %1396 }
0x221b   :  { %v1399_v3 = vmul.f32 %v1980_v0, %v1397_v63 }
0x221d   :  { %1401 = vrot.lane.b32.xlu1 %v1399_v3, %s2002_s24 }
0x228f   :  { %v1402_v5 = vpop.permute.xlu1 %1401 }
0x2290   :  { %v1404_v6 = vadd.f32 %v1402_v5, %v1394_v4 }
0x2292   :  { %1981 = vtanh.f32 %v1404_v6 }
0x229f   :  { %v1982_v7 = vpop.eup %1981 }
0x22a0   :  { %1407 = vrot.lane.b32.xlu0 %v1982_v7, %s2001_s23 }
0x22a4   :  { %1412 = vrot.lane.b32.xlu0 %v1404_v6, %s2003_s25 }
0x2312   :  { %v1408_v8 = vpop.permute.xlu0 %1407 }
0x2313   :  { %v1410_v9 = vmul.f32 %v1980_v0, %v1408_v8 }
0x2315   :  { %1417 = vrot.lane.b32.xlu1 %v1410_v9, %s2002_s24 }
0x2316   :  { %v1413_v12 = vpop.permute.xlu0 %1412 }
0x2317   :  { %1415 = vst.msk [vmem:[#allocation4 + $0x8] sm:$0xff] %vm25_vm0, %v1413_v12 }
0x231e   :  { %v1425_v13 = vld [vmem:[#allocation4 + $0x8] sm:$0xff] }
0x231f   :  { %1479 = vrot.lane.b32.xlu0 %v1425_v13, %s2002_s24 }
0x2387   :  { %v1418_v14 = vpop.permute.xlu1 %1417 }
0x2388   :  { %1420 = vst.msk [vmem:[#allocation3 + $0x8] sm:$0xff] %vm25_vm0, %v1418_v14  ;;  %1659 = vst.msk [vmem:[%s2465_s5 + $0x28] sm:$0xff] %vm25_vm0, %v1418_v14 }
0x238f   :  { %v1424_v46 = vld [vmem:[#allocation3 + $0x8] sm:$0xff] }
0x2390   :  { %v1426_v15 = vpack.c.bf16 %v1424_v46, %v1424_v46 }
0x2391   :  { %v1480_v30 = vpop.permute.xlu0 %1479 }
0x2392   :  { %1849 = vmatmul.mubr.msk.bf16.vlgmr.msra.gmra.mxu0 %vm25_vm0, %v1426_v15 }
0x2452   :  { %v1464_v17 = vpop.f32.mrf.mxu0 }
0x2453   :  { %v1470_v2 = vadd.f32 %v1464_v17, %v863_v16 }
0x2454   :  { %v1850_v18 = vpop.f32.mrf.mxu0 }
0x2455   :  { %1983 = vtanh.f32 %v1470_v2  ;;  %v1661_v22 = vmul.f32 -1.442695, %v1470_v2 }
0x2456   :  { %v1467_v19 = vpop.f32.mrf.mxu0 }
0x2457   :  { %1985 = vpow2.f32 %v1661_v22 }
0x2458   :  { %v1851_v20 = vpop.f32.mrf.mxu0 }
0x2462   :  { %v1984_v21 = vpop.eup %1983 }
0x2463   :  { %1484 = vrot.lane.b32.xlu1 %v1984_v21, %s2001_s23 }
0x2464   :  { %v1986_v23 = vpop.eup %1985 }
0x2465   :  { %v1474_v24 = vadd.f32 1.0, %v1986_v23 }
0x2467   :  { %1987 = vrcp.f32 %v1474_v24 }
0x2474   :  { %v1988_v25 = vpop.eup %1987 }
0x2475   :  { %v1482_v28 = vmul.f32 %v1988_v25, %v1480_v30 }
0x24d5   :  { %v1485_v26 = vpop.permute.xlu1 %1484 }
0x24d6   :  { %v1487_v27 = vmul.f32 %v1988_v25, %v1485_v26 }
0x24d8   :  { %1489 = vrot.lane.b32.xlu1 %v1487_v27, %s2002_s24 }
0x254a   :  { %v1490_v29 = vpop.permute.xlu1 %1489 }
0x254b   :  { %v1492_v34 = vadd.f32 %v1490_v29, %v1482_v28 }
0x254d   :  { %1989 = vtanh.f32 %v1492_v34 }
0x255a   :  { %v1990_v35 = vpop.eup %1989 }
0x255b   :  { %1495 = vrot.lane.b32.xlu0 %v1990_v35, %s2001_s23 }
0x255f   :  { %1500 = vrot.lane.b32.xlu0 %v1492_v34, %s2003_s25 }
0x25cd   :  { %v1496_v36 = vpop.permute.xlu0 %1495 }
0x25ce   :  { %v1498_v37 = vmul.f32 %v1988_v25, %v1496_v36 }
0x25d0   :  { %1505 = vrot.lane.b32.xlu1 %v1498_v37, %s2002_s24 }
0x25d1   :  { %v1501_v38 = vpop.permute.xlu0 %1500 }
0x25d2   :  { %1503 = vst.msk [vmem:[#allocation4 + $0x8] sm:$0xff] %vm25_vm0, %v1501_v38 }
0x25d9   :  { %v1513_v39 = vld [vmem:[#allocation4 + $0x8] sm:$0xff] }
0x25da   :  { %1567 = vrot.lane.b32.xlu0 %v1513_v39, %s2002_s24 }
0x2642   :  { %v1506_v40 = vpop.permute.xlu1 %1505 }
0x2643   :  { %1508 = vst.msk [vmem:[#allocation3 + $0x8] sm:$0xff] %vm25_vm0, %v1506_v40  ;;  %1662 = vst.msk [vmem:[%s2465_s5 + $0x30] sm:$0xff] %vm25_vm0, %v1506_v40 }
0x264a   :  { %v1512_v41 = vld [vmem:[#allocation3 + $0x8] sm:$0xff] }
0x264b   :  { %v1514_v31 = vpack.c.bf16 %v1512_v41, %v1512_v41 }
0x264c   :  { %v1568_v1 = vpop.permute.xlu0 %1567 }
0x264d   :  { %1857 = vmatmul.mubr.msk.bf16.vlgmr.msra.gmra.mxu1 %vm25_vm0, %v1514_v31 }
0x270d   :  { %v1552_v43 = vpop.f32.mrf.mxu1 }
0x270e   :  { %v1558_v44 = vadd.f32 %v1552_v43, %v866_v42 }
0x270f   :  { %v1858_v45 = vpop.f32.mrf.mxu1 }
0x2710   :  { %1991 = vtanh.f32 %v1558_v44  ;;  %v1664_v49 = vmul.f32 -1.442695, %v1558_v44 }
0x2711   :  { %v1555_v47 = vpop.f32.mrf.mxu1 }
0x2712   :  { %1993 = vpow2.f32 %v1664_v49 }
0x2713   :  { %v1859_v10 = vpop.f32.mrf.mxu1 }
0x271d   :  { %v1992_v48 = vpop.eup %1991 }
0x271e   :  { %1572 = vrot.lane.b32.xlu1 %v1992_v48, %s2001_s23 }
0x271f   :  { %v1994_v50 = vpop.eup %1993 }
0x2720   :  { %v1562_v51 = vadd.f32 1.0, %v1994_v50 }
0x2722   :  { %1995 = vrcp.f32 %v1562_v51 }
0x272f   :  { %v1996_v52 = vpop.eup %1995 }
0x2730   :  { %v1570_v32 = vmul.f32 %v1996_v52, %v1568_v1 }
0x2790   :  { %v1573_v53 = vpop.permute.xlu1 %1572 }
0x2791   :  { %v1575_v54 = vmul.f32 %v1996_v52, %v1573_v53 }
0x2793   :  { %1577 = vrot.lane.b32.xlu1 %v1575_v54, %s2002_s24 }
0x2797   :  { %746 = vrot.lane.b32.xlu1 %v2312_v11, %s2003_s25 }
0x2805   :  { %v1578_v55 = vpop.permute.xlu1 %1577 }
0x2806   :  { %v1580_v56 = vadd.f32 %v1578_v55, %v1570_v32 }
0x2808   :  { %1997 = vtanh.f32 %v1580_v56 }
0x2809   :  { %v747_v57 = vpop.permute.xlu1 %746 }
0x280a   :  { %749 = vst.msk [vmem:[#allocation4] sm:$0xff] %vm25_vm0, %v747_v57 }
0x2815   :  { %v1998_v58 = vpop.eup %1997 }
0x2816   :  { %1583 = vrot.lane.b32.xlu0 %v1998_v58, %s2001_s23 }
0x281a   :  { %1588 = vrot.lane.b32.xlu0 %v1580_v56, %s2003_s25 }
0x2888   :  { %v1584_v59 = vpop.permute.xlu0 %1583 }
0x2889   :  { %v1586_v61 = vmul.f32 %v1996_v52, %v1584_v59 }
0x288b   :  { %1593 = vrot.lane.b32.xlu1 %v1586_v61, %s2002_s24 }
0x288c   :  { %v1589_v60 = vpop.permute.xlu0 %1588 }
0x288d   :  { %1591 = vst.msk [vmem:[#allocation4 + $0x8] sm:$0xff] %vm25_vm0, %v1589_v60 }
0x28fd   :  { %v1594_v11 = vpop.permute.xlu1 %1593 }
0x28fe   :  { %1596 = vst.msk [vmem:[#allocation3 + $0x8] sm:$0xff] %vm25_vm0, %v1594_v11  ;;  %1665 = vst.msk [vmem:[%s2465_s5 + $0x38] sm:$0xff] %vm25_vm0, %v1594_v11 }

</bundles_post_ra>
